<compile_context>
chip_gen: v7x
topology: tpu7x:2x2x1
jax: 0.10.0
libtpu: 0.0.40
codegen_flags: <defaults>
</compile_context>

<pallas_src>
import functools

import jax
import jax.numpy as jnp
from jax import lax
from jax.experimental import pallas as pl
from jax.experimental.pallas import tpu as pltpu


def _round_up(x, m):
    return (x + m - 1) // m * m


# ----------------------------------------------------------------------------
# Pallas kernels
# ----------------------------------------------------------------------------
def _conv_kernel(x_ref, w_ref, y_ref, s_ref, *, tm, tap_offsets, Wp, OW, L_real,
                 epi_lrelu, compute_stats):
    """One (batch element, M-chunk) grid step of a 4x4 / stride-2 / pad-1 conv.

    x_ref : (1, Lin_pad, K)  bf16  packed input rows for this batch element
                                   (block is revisited across the inner M axis)
    w_ref : (n_taps, K, OCp) bf16  one weight slab per row-shift tap
    y_ref : (1, tm, OCp)     bf16  raw conv output chunk (lane-dense)
    s_ref : (1, 1, 2, OCp)   f32   masked [sum; sum_sq] for BatchNorm stats
    """
    ocp = y_ref.shape[-1]
    m0 = pl.multiple_of(pl.program_id(1) * tm, tm)

    # tm is chosen so this accumulator is <= 64 KiB (no vreg spills).
    acc = jnp.zeros((tm, ocp), jnp.float32)
    for t, off in enumerate(tap_offsets):          # static: 1 or 2 taps
        start = pl.multiple_of(m0 + off, 8)        # off in {0, Wp}, Wp % 8 == 0
        patch = x_ref[0, pl.ds(start, tm), :]
        acc = acc + jnp.dot(patch, w_ref[t], preferred_element_type=jnp.float32)

    if epi_lrelu:                                  # layer-1 LeakyReLU, f32 epilogue
        acc = jnp.where(acc >= 0.0, acc, 0.2 * acc)
    y_ref[0, :, :] = acc.astype(y_ref.dtype)

    if compute_stats:
        # Fused BatchNorm batch statistics; junk columns (ow >= OW) and row
        # padding (row >= L_real) are masked out.  Mask is built in-kernel
        # from iota (no lane-sparse mask input).
        row = m0 + lax.broadcasted_iota(jnp.int32, (tm, 1), 0)
        if (Wp & (Wp - 1)) == 0:                   # Wp is a power of two here
            col = jnp.bitwise_and(row, Wp - 1)
        else:
            col = jnp.remainder(row, Wp)
        valid = jnp.logical_and(col < OW, row < L_real)
        am = acc * valid.astype(jnp.float32)
        ssum = jnp.sum(am, axis=0, keepdims=True)
        ssq = jnp.sum(am * acc, axis=0, keepdims=True)
        s_ref[0, 0, :, :] = jnp.concatenate([ssum, ssq], axis=0)
    else:
        s_ref[...] = jnp.zeros_like(s_ref)


def _head_kernel(x_ref, sc_ref, sh_ref, w_ref, o_ref):
    """BatchNorm + LeakyReLU of conv4 fused with the final 4x4 valid conv to a
    single channel + sigmoid.  N=1 is a degenerate MXU shape, so this is a VPU
    reduction.  Junk rows / pad channels of x get zero weight -> contribute 0.

    x_ref  : (tb, L4, OCp) bf16  raw conv-4 output
    sc_ref : (1, 1, OCp)   f32   BN scale (0 on pad channels)
    sh_ref : (1, 1, OCp)   f32   BN shift (0 on pad channels)
    w_ref  : (L4, OCp)     f32   conv-5 weight in the same (row, channel) layout
    o_ref  : (tb, 1)       f32   sigmoid(D(x))
    """
    a = x_ref[...].astype(jnp.float32) * sc_ref[...] + sh_ref[...]
    a = jnp.where(a >= 0.0, a, 0.2 * a)
    s = jnp.sum(a * w_ref[...], axis=2)            # (tb, L4)
    s = jnp.sum(s, axis=1, keepdims=True)          # (tb, 1)
    o_ref[...] = jax.nn.sigmoid(s)


# ----------------------------------------------------------------------------
# pallas_call wrappers
# ----------------------------------------------------------------------------
def _pick_tm(L_real, ocp):
    # Bound the f32 accumulator: tm * ocp * 4B <= 64 KiB, tm a multiple of 16,
    # and never below 128 when OCp == 128 (full-width M on the 256-wide MXU).
    tm = max(16, min(128, (16384 // ocp) // 16 * 16))
    tm = min(tm, _round_up(L_real, 16))
    return tm


def conv4x4(x_packed, w_taps, meta, *, epi_lrelu, compute_stats):
    """4x4 / stride-2 / pad-1 conv over the packed input (no im2col inflation
    for layers 2-4; plain im2col only for the tiny-K layer 1)."""
    B, Lin_pad, K = x_packed.shape
    n_taps, Kw, ocp = w_taps.shape
    assert Kw == K
    tm, Lout_pad = meta["tm"], meta["Lout_pad"]
    nm = Lout_pad // tm
    tap_offsets = (0,) if n_taps == 1 else (0, meta["Wp"])

    kernel = functools.partial(
        _conv_kernel, tm=tm, tap_offsets=tap_offsets, Wp=meta["Wp"],
        OW=meta["OW"], L_real=meta["L_real"], epi_lrelu=epi_lrelu,
        compute_stats=compute_stats)

    # Per-step VMEM: 2x input block + weights (2x margin) + 2x output + stats.
    est = (2 * Lin_pad * K * 2 + 2 * n_taps * K * ocp * 2
           + 2 * tm * ocp * 2 + 2 * 2 * ocp * 4)
    vmem_limit = min(max(est + (4 << 20), 32 << 20), 100 << 20)

    y, stats = pl.pallas_call(
        kernel,
        out_shape=(jax.ShapeDtypeStruct((B, Lout_pad, ocp), jnp.bfloat16),
                   jax.ShapeDtypeStruct((B, nm, 2, ocp), jnp.float32)),
        grid_spec=pltpu.PrefetchScalarGridSpec(
            num_scalar_prefetch=0,
            grid=(B, nm),                           # b outer, M-chunk inner:
            in_specs=[                              # x block reused across m.
                pl.BlockSpec((1, Lin_pad, K), lambda b, m: (b, 0, 0)),
                # grid-invariant weights: single-buffered (halves weight VMEM)
                pl.BlockSpec((n_taps, K, ocp), lambda b, m: (0, 0, 0),
                             pipeline_mode=pl.Buffered(1)),
            ],
            out_specs=[
                pl.BlockSpec((1, tm, ocp), lambda b, m: (b, m, 0)),
                pl.BlockSpec((1, 1, 2, ocp), lambda b, m: (b, m, 0, 0)),
            ],
        ),
        compiler_params=pltpu.CompilerParams(
            dimension_semantics=("parallel", "parallel"),
            vmem_limit_bytes=vmem_limit),
    )(x_packed, w_taps)
    return y, stats


def head_sigmoid(y4, scale_p, shift_p, w_head):
    B, L4, ocp = y4.shape
    tb = B if (B <= 8 or B % 8 != 0) else 8
    est = 2 * tb * L4 * ocp * 2 + 2 * L4 * ocp * 4 + (2 << 20)
    vmem_limit = min(max(est, 32 << 20), 100 << 20)
    return pl.pallas_call(
        _head_kernel,
        out_shape=jax.ShapeDtypeStruct((B, 1), jnp.float32),
        grid_spec=pltpu.PrefetchScalarGridSpec(
            num_scalar_prefetch=0,
            grid=(B // tb,),
            in_specs=[
                pl.BlockSpec((tb, L4, ocp), lambda i: (i, 0, 0)),
                pl.BlockSpec((1, 1, ocp), lambda i: (0, 0, 0)),
                pl.BlockSpec((1, 1, ocp), lambda i: (0, 0, 0)),
                pl.BlockSpec((L4, ocp), lambda i: (0, 0)),
            ],
            out_specs=pl.BlockSpec((tb, 1), lambda i: (i, 0)),
        ),
        compiler_params=pltpu.CompilerParams(
            dimension_semantics=("parallel",),
            vmem_limit_bytes=vmem_limit),
    )(y4, scale_p, shift_p, w_head)


# ----------------------------------------------------------------------------
# Host-side packing (pure layout passes, fused by XLA) and parameters
# ----------------------------------------------------------------------------
def prep_im2col_l1(x_nhwc, ocp):
    """Layer 1 (IC=nc is tiny): plain im2col so all 16 taps fold into ONE dot
    with K = 16*nc instead of a 12-wide, lane-sparse s2d formulation."""
    B, H, W, C = x_nhwc.shape
    OH, OW = H // 2, W // 2
    xp = jnp.pad(x_nhwc, ((0, 0), (1, 1), (1, 1), (0, 0)))
    cols = []
    for kh in range(4):
        for kw in range(4):
            cols.append(xp[:, kh:kh + 2 * OH:2, kw:kw + 2 * OW:2, :])
    p = jnp.concatenate(cols, axis=-1).reshape(B, OH * OW, 16 * C)
    L_real = OH * OW
    tm = _pick_tm(L_real, ocp)
    Lout_pad = _round_up(L_real, tm)
    if Lout_pad > L_real:
        p = jnp.pad(p, ((0, 0), (0, Lout_pad - L_real), (0, 0)))
    meta = dict(OH=OH, OW=OW, Wp=OW, L_real=L_real, Lout_pad=Lout_pad, tm=tm)
    return p.astype(jnp.bfloat16), meta


def prep_packed(a_nhwc, ocp_next):
    """pad(1) + space-to-depth(2) + dj-pair pack (8*C channels) + flatten.

    Folding the kernel-column pair into the channel dim leaves a single
    whole-row shift of Wp (multiple of 8) in the kernel -> sublane-aligned MXU
    patch slices, and no wrap-around junk column when OW % 8 == 0."""
    B, Hin, Win, C = a_nhwc.shape
    OH, OW = Hin // 2, Win // 2
    Wp = _round_up(OW, 8)
    ap = jnp.pad(a_nhwc, ((0, 0), (1, 1), (1, 1), (0, 0)))
    Hs, Ws = OH + 1, OW + 1
    s2d = ap.reshape(B, Hs, 2, Ws, 2, C)
    s2d = jnp.transpose(s2d, (0, 1, 3, 2, 4, 5)).reshape(B, Hs, Ws, 4 * C)
    p = jnp.concatenate([s2d[:, :, :OW, :], s2d[:, :, 1:OW + 1, :]], axis=-1)
    p = jnp.pad(p, ((0, 0), (0, 0), (0, Wp - OW), (0, 0)))
    p = p.reshape(B, Hs * Wp, 8 * C)

    L_real = OH * Wp
    tm = _pick_tm(L_real, ocp_next)
    Lout_pad = _round_up(L_real, tm)
    Lin_need = Lout_pad + Wp                      # last chunk's di=1 tap reads here
    if p.shape[1] < Lin_need:
        p = jnp.pad(p, ((0, 0), (0, Lin_need - p.shape[1]), (0, 0)))
    assert p.shape[1] >= Lout_pad + Wp, "packed input too short for shifted reads"
    meta = dict(OH=OH, OW=OW, Wp=Wp, L_real=L_real, Lout_pad=Lout_pad, tm=tm)
    return p.astype(jnp.bfloat16), meta


def unpack_y(y, meta, oc):
    B = y.shape[0]
    OH, OW, Wp = meta["OH"], meta["OW"], meta["Wp"]
    return y[:, :OH * Wp, :].reshape(B, OH, Wp, -1)[:, :, :OW, :oc]


def im2col_weight(w_oihw, ocp):
    OC, IC, KH, KW = w_oihw.shape
    w = jnp.transpose(w_oihw, (2, 3, 1, 0)).reshape(KH * KW * IC, OC)
    w = jnp.pad(w, ((0, 0), (0, ocp - OC)))
    return w[None].astype(jnp.bfloat16)           # (1, 16*IC, OCp)


def tap_weight(w_oihw, ocp):
    """torch (OC, IC, 4, 4) -> (2, 8*IC, OCp): one slab per row-shift tap di,
    channel order (dj, pi, pj, c) matching the dj-pair packed input; OC padded
    to a multiple of 128 for lane-dense output stores."""
    OC, IC, KH, KW = w_oihw.shape
    assert KH == 4 and KW == 4
    w = w_oihw.reshape(OC, IC, 2, 2, 2, 2)        # (oc, c, di, pi, dj, pj)
    w = jnp.transpose(w, (2, 4, 3, 5, 1, 0))      # (di, dj, pi, pj, c, oc)
    w = w.reshape(2, 8 * IC, OC)
    w = jnp.pad(w, ((0, 0), (0, 0), (0, ocp - OC)))
    return w.astype(jnp.bfloat16)


def make_params(key, nc, ndf):
    shapes = [
        (ndf, nc, 4, 4),
        (ndf * 2, ndf, 4, 4),
        (ndf * 4, ndf * 2, 4, 4),
        (ndf * 8, ndf * 4, 4, 4),
        (1, ndf * 8, 4, 4),
    ]
    ks = jax.random.split(key, 5)
    conv_w = [0.02 * jax.random.normal(k, s, jnp.float32) for k, s in zip(ks, shapes)]
    return {
        "conv_oihw": conv_w,                                        # reference path
        "w1": im2col_weight(conv_w[0], _round_up(ndf, 128)),
        "w_taps": [tap_weight(conv_w[i], _round_up(conv_w[i].shape[0], 128))
                   for i in (1, 2, 3)],
        # BatchNorm2d default init (weight=1, bias=0); training-mode batch stats.
        "gamma": [jnp.ones((c,), jnp.float32) for c in (ndf * 2, ndf * 4, ndf * 8)],
        "beta": [jnp.zeros((c,), jnp.float32) for c in (ndf * 2, ndf * 4, ndf * 8)],
    }


# ----------------------------------------------------------------------------
# Discriminator forward (Pallas) and pure-JAX reference
# ----------------------------------------------------------------------------
@functools.partial(jax.jit, static_argnames=("ndf",))
def discriminator_forward(x_nchw, params, *, ndf):
    x = jnp.transpose(x_nchw, (0, 2, 3, 1))                 # NHWC
    B = x.shape[0]
    eps = 1e-5
    ocs = [ndf, ndf * 2, ndf * 4, ndf * 8]
    ocps = [_round_up(c, 128) for c in ocs]

    # ---- layer 1: conv + LeakyReLU (fused epilogue) -------------------------
    xp, meta = prep_im2col_l1(x, ocps[0])
    y, _ = conv4x4(xp, params["w1"], meta, epi_lrelu=True, compute_stats=False)
    a = unpack_y(y, meta, ocs[0])                           # (B, 32, 32, ndf) bf16

    y4 = scale_p = shift_p = l4 = None
    # ---- layers 2..4: conv + fused (masked) BatchNorm statistics ------------
    for li in range(3):                                     # conv2, conv3, conv4
        oc, ocp = ocs[li + 1], ocps[li + 1]
        xp, meta = prep_packed(a, ocp)
        y, stats = conv4x4(xp, params["w_taps"][li], meta,
                           epi_lrelu=False, compute_stats=True)
        cnt = jnp.float32(B * meta["OH"] * meta["OW"])
        ssum = jnp.sum(stats[:, :, 0, :oc], axis=(0, 1))
        ssq = jnp.sum(stats[:, :, 1, :oc], axis=(0, 1))
        mean = ssum / cnt
        var = jnp.maximum(ssq / cnt - mean * mean, 0.0)     # clamp for safety
        scale = params["gamma"][li] * lax.rsqrt(var + eps)
        shift = params["beta"][li] - mean * scale
        if li < 2:
            # BN + LeakyReLU in f32; the zero spatial padding of the next conv
            # must follow this, so it stays in XLA fused with the next repack.
            yv = unpack_y(y, meta, oc).astype(jnp.float32)
            yn = yv * scale + shift
            a = jnp.where(yn >= 0.0, yn, 0.2 * yn)
        else:
            # layer 4 feeds the 4x4 valid head: fold BN + LeakyReLU into the
            # head kernel prologue (no padding involved -> exact).
            assert meta["OH"] == 4 and meta["OW"] == 4, "head expects 4x4 input"
            y4, l4 = y, meta
            scale_p = jnp.pad(scale, (0, ocp - oc)).reshape(1, 1, ocp)
            shift_p = jnp.pad(shift, (0, ocp - oc)).reshape(1, 1, ocp)

    # Head weight laid out to match y4's (row = oh*Wp + ow, channel) layout;
    # junk rows / pad channels get weight 0 and contribute nothing.
    w5 = params["conv_oihw"][4][0]                          # (8*ndf, 4, 4) = (c,kh,kw)
    wh = jnp.transpose(w5, (1, 2, 0))                       # (kh, kw, c)
    wh = jnp.pad(wh, ((0, 0), (0, l4["Wp"] - l4["OW"]), (0, ocps[3] - ocs[3])))
    wh = wh.reshape(l4["OH"] * l4["Wp"], ocps[3])
    wh = jnp.pad(wh, ((0, y4.shape[1] - wh.shape[0]), (0, 0)))

    out = head_sigmoid(y4, scale_p, shift_p, wh)
    return out.reshape(B, 1, 1, 1)                          # NCHW (B, 1, 1, 1)


@jax.jit
def reference_forward(x_nchw, params):
    def conv(x, w, stride, pad):
        return lax.conv_general_dilated(
            x, w, (stride, stride), [(pad, pad), (pad, pad)],
            dimension_numbers=("NCHW", "OIHW", "NCHW"))

    def lrelu(x):
        return jnp.where(x >= 0, x, 0.2 * x)

    def bn(x, g, b, eps=1e-5):
        mean = jnp.mean(x, axis=(0, 2, 3), keepdims=True)
        var = jnp.mean(jnp.square(x - mean), axis=(0, 2, 3), keepdims=True)
        xn = (x - mean) * lax.rsqrt(var + eps)
        return xn * g.reshape(1, -1, 1, 1) + b.reshape(1, -1, 1, 1)

    w = params["conv_oihw"]
    x = lrelu(conv(x_nchw, w[0], 2, 1))
    x = lrelu(bn(conv(x, w[1], 2, 1), params["gamma"][0], params["beta"][0]))
    x = lrelu(bn(conv(x, w[2], 2, 1), params["gamma"][1], params["beta"][1]))
    x = lrelu(bn(conv(x, w[3], 2, 1), params["gamma"][2], params["beta"][2]))
    x = jax.nn.sigmoid(conv(x, w[4], 1, 0))
    return x


# ----------------------------------------------------------------------------
if __name__ == "__main__":
    # DCGAN discriminator geometry: 64x64 input -> 32 -> 16 -> 8 -> 4 -> 1x1.
    # Small ndf for the correctness test only; tiling is derived per layer so
    # the same code handles realistic ndf (the review's benchmarking note).
    B, NC, NDF, HW = 2, 3, 16, 64

    key = jax.random.PRNGKey(0)
    k_x, k_p = jax.random.split(key)
    x = jax.random.normal(k_x, (B, NC, HW, HW), jnp.float32)
    params = make_params(k_p, NC, NDF)

    out = jax.block_until_ready(discriminator_forward(x, params, ndf=NDF))
    ref = jax.block_until_ready(reference_forward(x, params))

    assert out.shape == (B, 1, 1, 1), out.shape
    max_err = float(jnp.max(jnp.abs(out - ref)))
    # bf16 activations/weights in the Pallas path vs. f32 reference.
    assert max_err < 3e-2, (max_err, out, ref)
    print("KERNEL_OK")
</pallas_src>

<mosaic_0001>
module attributes {stable_mosaic.version = 11 : i64} {
  func.func @_conv_kernel(%arg0: i32, %arg1: i32, %arg2: memref<1x1024x48xbf16, #tpu.memory_space<vmem>>, %arg3: memref<1x48x128xbf16, #tpu.memory_space<vmem>>, %arg4: memref<1x128x128xbf16, #tpu.memory_space<vmem>>, %arg5: memref<1x1x2x128xf32, #tpu.memory_space<vmem>>) attributes {dimension_semantics = [#tpu.dimension_semantics<parallel>, #tpu.dimension_semantics<parallel>], iteration_bounds = array<i64: 2, 8>, scalar_prefetch = 0 : i64, scratch_operands = 0 : i64, tpu.core_type = #tpu.core_type<tc>, window_params = [{transform_indices = @transform_0, window_bounds = array<i64: 1, 1024, 48>}, {pipeline_mode = #tpu.pipeline_mode<synchronous>, transform_indices = @transform_1, window_bounds = array<i64: 1, 48, 128>}, {transform_indices = @transform_2, window_bounds = array<i64: 1, 128, 128>}, {transform_indices = @transform_3, window_bounds = array<i64: 1, 1, 2, 128>}]} {
    %c128_i32 = arith.constant 128 : i32
    %0 = arith.muli %arg1, %c128_i32 : i32
    %1 = tpu.assume_multiple %0, 128 : i32
    %cst = arith.constant 0.000000e+00 : f32
    %2 = vector.broadcast %cst : f32 to vector<128x128xf32>
    %c0_i32 = arith.constant 0 : i32
    %3 = arith.addi %1, %c0_i32 : i32
    %4 = tpu.assume_multiple %3, 8 : i32
    %c0 = arith.constant 0 : index
    %5 = arith.index_cast %4 : i32 to index
    %c0_0 = arith.constant 0 : index
    %6 = vector.load %arg2[%c0, %5, %c0_0] : memref<1x1024x48xbf16, #tpu.memory_space<vmem>>, vector<1x128x48xbf16>
    %7 = vector.shape_cast %6 : vector<1x128x48xbf16> to vector<128x48xbf16>
    %c0_1 = arith.constant 0 : index
    %c0_2 = arith.constant 0 : index
    %c0_3 = arith.constant 0 : index
    %8 = vector.load %arg3[%c0_1, %c0_2, %c0_3] : memref<1x48x128xbf16, #tpu.memory_space<vmem>>, vector<1x48x128xbf16>
    %9 = vector.shape_cast %8 : vector<1x48x128xbf16> to vector<48x128xbf16>
    %cst_4 = arith.constant dense<0.000000e+00> : vector<128x128xf32>
    %10 = tpu.matmul %7, %9, %cst_4 {dimension_numbers = #tpu.dot_dimension_numbers<[1], [0], [0], [1], [0, 0, 1, 1], [], []>} : vector<128x48xbf16>, vector<48x128xbf16>, vector<128x128xf32> -> vector<128x128xf32>
    %11 = arith.addf %2, %10 : vector<128x128xf32>
    %cst_5 = arith.constant 0.000000e+00 : f32
    %12 = vector.broadcast %cst_5 : f32 to vector<128x128xf32>
    %13 = arith.cmpf oge, %11, %12 : vector<128x128xf32>
    %cst_6 = arith.constant 2.000000e-01 : f32
    %14 = vector.broadcast %cst_6 : f32 to vector<128x128xf32>
    %15 = arith.mulf %14, %11 : vector<128x128xf32>
    %16 = arith.select %13, %11, %15 : vector<128x128xi1>, vector<128x128xf32>
    %17 = arith.truncf %16 : vector<128x128xf32> to vector<128x128xbf16>
    %c0_7 = arith.constant 0 : index
    %c0_8 = arith.constant 0 : index
    %c0_9 = arith.constant 0 : index
    %18 = vector.load %arg4[%c0_7, %c0_8, %c0_9] : memref<1x128x128xbf16, #tpu.memory_space<vmem>>, vector<1x128x128xbf16>
    %19 = vector.shape_cast %18 : vector<1x128x128xbf16> to vector<128x128xbf16>
    %20 = vector.shape_cast %17 : vector<128x128xbf16> to vector<1x128x128xbf16>
    tpu.vector_store %arg4[%c0_7, %c0_8, %c0_9], %20 {strides = array<i32>} : memref<1x128x128xbf16, #tpu.memory_space<vmem>>, vector<1x128x128xbf16>,
    %cst_10 = arith.constant 0.000000e+00 : f32
    %21 = vector.broadcast %cst_10 : f32 to vector<1x1x2x128xf32>
    %c0_11 = arith.constant 0 : index
    %c0_12 = arith.constant 0 : index
    %c0_13 = arith.constant 0 : index
    %c0_14 = arith.constant 0 : index
    %22 = vector.load %arg5[%c0_11, %c0_12, %c0_13, %c0_14] : memref<1x1x2x128xf32, #tpu.memory_space<vmem>>, vector<1x1x2x128xf32>
    tpu.vector_store %arg5[%c0_11, %c0_12, %c0_13, %c0_14], %21 {strides = array<i32>} : memref<1x1x2x128xf32, #tpu.memory_space<vmem>>, vector<1x1x2x128xf32>,
    return
  }
  func.func @transform_0(%arg0: i32, %arg1: i32) -> (i32, i32, i32) {
    %c0_i32 = arith.constant 0 : i32
    %c0_i32_0 = arith.constant 0 : i32
    %c0_i32_1 = arith.constant 0 : i32
    return %arg0, %c0_i32, %c0_i32_0 : i32, i32, i32
  }
  func.func @transform_1(%arg0: i32, %arg1: i32) -> (i32, i32, i32) {
    %c0_i32 = arith.constant 0 : i32
    %c0_i32_0 = arith.constant 0 : i32
    %c0_i32_1 = arith.constant 0 : i32
    %c0_i32_2 = arith.constant 0 : i32
    return %c0_i32, %c0_i32_0, %c0_i32_1 : i32, i32, i32
  }
  func.func @transform_2(%arg0: i32, %arg1: i32) -> (i32, i32, i32) {
    %c0_i32 = arith.constant 0 : i32
    %c0_i32_0 = arith.constant 0 : i32
    return %arg0, %arg1, %c0_i32 : i32, i32, i32
  }
  func.func @transform_3(%arg0: i32, %arg1: i32) -> (i32, i32, i32, i32) {
    %c0_i32 = arith.constant 0 : i32
    %c0_i32_0 = arith.constant 0 : i32
    %c0_i32_1 = arith.constant 0 : i32
    return %arg0, %arg1, %c0_i32, %c0_i32_0 : i32, i32, i32, i32
  }
}

module attributes {stable_mosaic.version = 11 : i64} {
  func.func @_conv_kernel(%arg0: i32, %arg1: i32, %arg2: memref<1x272x128xbf16, #tpu.memory_space<vmem>>, %arg3: memref<2x128x128xbf16, #tpu.memory_space<vmem>>, %arg4: memref<1x128x128xbf16, #tpu.memory_space<vmem>>, %arg5: memref<1x1x2x128xf32, #tpu.memory_space<vmem>>) attributes {dimension_semantics = [#tpu.dimension_semantics<parallel>, #tpu.dimension_semantics<parallel>], iteration_bounds = array<i64: 2, 2>, scalar_prefetch = 0 : i64, scratch_operands = 0 : i64, tpu.core_type = #tpu.core_type<tc>, window_params = [{transform_indices = @transform_0, window_bounds = array<i64: 1, 272, 128>}, {pipeline_mode = #tpu.pipeline_mode<synchronous>, transform_indices = @transform_1, window_bounds = array<i64: 2, 128, 128>}, {transform_indices = @transform_2, window_bounds = array<i64: 1, 128, 128>}, {transform_indices = @transform_3, window_bounds = array<i64: 1, 1, 2, 128>}]} {
    %c128_i32 = arith.constant 128 : i32
    %0 = arith.muli %arg1, %c128_i32 : i32
    %1 = tpu.assume_multiple %0, 128 : i32
    %cst = arith.constant 0.000000e+00 : f32
    %2 = vector.broadcast %cst : f32 to vector<128x128xf32>
    %c0_i32 = arith.constant 0 : i32
    %3 = arith.addi %1, %c0_i32 : i32
    %4 = tpu.assume_multiple %3, 8 : i32
    %c0 = arith.constant 0 : index
    %5 = arith.index_cast %4 : i32 to index
    %c0_0 = arith.constant 0 : index
    %6 = vector.load %arg2[%c0, %5, %c0_0] : memref<1x272x128xbf16, #tpu.memory_space<vmem>>, vector<1x128x128xbf16>
    %7 = vector.shape_cast %6 : vector<1x128x128xbf16> to vector<128x128xbf16>
    %c0_1 = arith.constant 0 : index
    %c0_2 = arith.constant 0 : index
    %c0_3 = arith.constant 0 : index
    %8 = vector.load %arg3[%c0_1, %c0_2, %c0_3] : memref<2x128x128xbf16, #tpu.memory_space<vmem>>, vector<1x128x128xbf16>
    %9 = vector.shape_cast %8 : vector<1x128x128xbf16> to vector<128x128xbf16>
    %cst_4 = arith.constant dense<0.000000e+00> : vector<128x128xf32>
    %10 = tpu.matmul %7, %9, %cst_4 {dimension_numbers = #tpu.dot_dimension_numbers<[1], [0], [0], [1], [0, 0, 1, 1], [], []>} : vector<128x128xbf16>, vector<128x128xbf16>, vector<128x128xf32> -> vector<128x128xf32>
    %11 = arith.addf %2, %10 : vector<128x128xf32>
    %c16_i32 = arith.constant 16 : i32
    %12 = arith.addi %1, %c16_i32 : i32
    %13 = tpu.assume_multiple %12, 8 : i32
    %c0_5 = arith.constant 0 : index
    %14 = arith.index_cast %13 : i32 to index
    %c0_6 = arith.constant 0 : index
    %15 = vector.load %arg2[%c0_5, %14, %c0_6] : memref<1x272x128xbf16, #tpu.memory_space<vmem>>, vector<1x128x128xbf16>
    %16 = vector.shape_cast %15 : vector<1x128x128xbf16> to vector<128x128xbf16>
    %c1 = arith.constant 1 : index
    %c0_7 = arith.constant 0 : index
    %c0_8 = arith.constant 0 : index
    %17 = vector.load %arg3[%c1, %c0_7, %c0_8] : memref<2x128x128xbf16, #tpu.memory_space<vmem>>, vector<1x128x128xbf16>
    %18 = vector.shape_cast %17 : vector<1x128x128xbf16> to vector<128x128xbf16>
    %cst_9 = arith.constant dense<0.000000e+00> : vector<128x128xf32>
    %19 = tpu.matmul %16, %18, %cst_9 {dimension_numbers = #tpu.dot_dimension_numbers<[1], [0], [0], [1], [0, 0, 1, 1], [], []>} : vector<128x128xbf16>, vector<128x128xbf16>, vector<128x128xf32> -> vector<128x128xf32>
    %20 = arith.addf %11, %19 : vector<128x128xf32>
    %21 = arith.truncf %20 : vector<128x128xf32> to vector<128x128xbf16>
    %c0_10 = arith.constant 0 : index
    %c0_11 = arith.constant 0 : index
    %c0_12 = arith.constant 0 : index
    %22 = vector.load %arg4[%c0_10, %c0_11, %c0_12] : memref<1x128x128xbf16, #tpu.memory_space<vmem>>, vector<1x128x128xbf16>
    %23 = vector.shape_cast %22 : vector<1x128x128xbf16> to vector<128x128xbf16>
    %24 = vector.shape_cast %21 : vector<128x128xbf16> to vector<1x128x128xbf16>
    tpu.vector_store %arg4[%c0_10, %c0_11, %c0_12], %24 {strides = array<i32>} : memref<1x128x128xbf16, #tpu.memory_space<vmem>>, vector<1x128x128xbf16>,
    %25 = tpu.iota {dimensions = array<i32: 0>} : vector<128x1xi32>
    %26 = vector.broadcast %1 : i32 to vector<128x1xi32>
    %27 = arith.addi %26, %25 : vector<128x1xi32>
    %c15_i32 = arith.constant 15 : i32
    %28 = vector.broadcast %c15_i32 : i32 to vector<128x1xi32>
    %29 = arith.andi %27, %28 : vector<128x1xi32>
    %c16_i32_13 = arith.constant 16 : i32
    %30 = vector.broadcast %c16_i32_13 : i32 to vector<128x1xi32>
    %31 = arith.cmpi slt, %29, %30 : vector<128x1xi32>
    %c256_i32 = arith.constant 256 : i32
    %32 = vector.broadcast %c256_i32 : i32 to vector<128x1xi32>
    %33 = arith.cmpi slt, %27, %32 : vector<128x1xi32>
    %34 = arith.andi %31, %33 : vector<128x1xi1>
    %35 = arith.extui %34 : vector<128x1xi1> to vector<128x1xi32>
    %36 = arith.sitofp %35 : vector<128x1xi32> to vector<128x1xf32>
    %37 = vector.broadcast %36 : vector<128x1xf32> to vector<128x128xf32>
    %38 = arith.mulf %20, %37 : vector<128x128xf32>
    %cst_14 = arith.constant dense<0.000000e+00> : vector<128xf32>
    %39 = vector.multi_reduction <add>, %38, %cst_14 [0] : vector<128x128xf32> to vector<128xf32>
    %40 = vector.shape_cast %39 : vector<128xf32> to vector<1x128xf32>
    %41 = arith.mulf %38, %20 : vector<128x128xf32>
    %cst_15 = arith.constant dense<0.000000e+00> : vector<128xf32>
    %42 = vector.multi_reduction <add>, %41, %cst_15 [0] : vector<128x128xf32> to vector<128xf32>
    %43 = vector.shape_cast %42 : vector<128xf32> to vector<1x128xf32>
    %44 = tpu.concatenate %40, %43 in 0 : vector<1x128xf32>, vector<1x128xf32> -> vector<2x128xf32>
    %c0_16 = arith.constant 0 : index
    %c0_17 = arith.constant 0 : index
    %c0_18 = arith.constant 0 : index
    %c0_19 = arith.constant 0 : index
    %45 = vector.load %arg5[%c0_16, %c0_17, %c0_18, %c0_19] : memref<1x1x2x128xf32, #tpu.memory_space<vmem>>, vector<1x1x2x128xf32>
    %46 = vector.shape_cast %45 : vector<1x1x2x128xf32> to vector<2x128xf32>
    %47 = vector.shape_cast %44 : vector<2x128xf32> to vector<1x1x2x128xf32>
    tpu.vector_store %arg5[%c0_16, %c0_17, %c0_18, %c0_19], %47 {strides = array<i32>} : memref<1x1x2x128xf32, #tpu.memory_space<vmem>>, vector<1x1x2x128xf32>,
    return
  }
  func.func @transform_0(%arg0: i32, %arg1: i32) -> (i32, i32, i32) {
    %c0_i32 = arith.constant 0 : i32
    %c0_i32_0 = arith.constant 0 : i32
    %c0_i32_1 = arith.constant 0 : i32
    return %arg0, %c0_i32, %c0_i32_0 : i32, i32, i32
  }
  func.func @transform_1(%arg0: i32, %arg1: i32) -> (i32, i32, i32) {
    %c0_i32 = arith.constant 0 : i32
    %c0_i32_0 = arith.constant 0 : i32
    %c0_i32_1 = arith.constant 0 : i32
    %c0_i32_2 = arith.constant 0 : i32
    return %c0_i32, %c0_i32_0, %c0_i32_1 : i32, i32, i32
  }
  func.func @transform_2(%arg0: i32, %arg1: i32) -> (i32, i32, i32) {
    %c0_i32 = arith.constant 0 : i32
    %c0_i32_0 = arith.constant 0 : i32
    return %arg0, %arg1, %c0_i32 : i32, i32, i32
  }
  func.func @transform_3(%arg0: i32, %arg1: i32) -> (i32, i32, i32, i32) {
    %c0_i32 = arith.constant 0 : i32
    %c0_i32_0 = arith.constant 0 : i32
    %c0_i32_1 = arith.constant 0 : i32
    return %arg0, %arg1, %c0_i32, %c0_i32_0 : i32, i32, i32, i32
  }
}

module attributes {stable_mosaic.version = 11 : i64} {
  func.func @_conv_kernel(%arg0: i32, %arg1: i32, %arg2: memref<1x72x256xbf16, #tpu.memory_space<vmem>>, %arg3: memref<2x256x128xbf16, #tpu.memory_space<vmem>>, %arg4: memref<1x64x128xbf16, #tpu.memory_space<vmem>>, %arg5: memref<1x1x2x128xf32, #tpu.memory_space<vmem>>) attributes {dimension_semantics = [#tpu.dimension_semantics<parallel>, #tpu.dimension_semantics<parallel>], iteration_bounds = array<i64: 2, 1>, scalar_prefetch = 0 : i64, scratch_operands = 0 : i64, tpu.core_type = #tpu.core_type<tc>, window_params = [{transform_indices = @transform_0, window_bounds = array<i64: 1, 72, 256>}, {pipeline_mode = #tpu.pipeline_mode<synchronous>, transform_indices = @transform_1, window_bounds = array<i64: 2, 256, 128>}, {transform_indices = @transform_2, window_bounds = array<i64: 1, 64, 128>}, {transform_indices = @transform_3, window_bounds = array<i64: 1, 1, 2, 128>}]} {
    %c64_i32 = arith.constant 64 : i32
    %0 = arith.muli %arg1, %c64_i32 : i32
    %1 = tpu.assume_multiple %0, 64 : i32
    %cst = arith.constant 0.000000e+00 : f32
    %2 = vector.broadcast %cst : f32 to vector<64x128xf32>
    %c0_i32 = arith.constant 0 : i32
    %3 = arith.addi %1, %c0_i32 : i32
    %4 = tpu.assume_multiple %3, 8 : i32
    %c0 = arith.constant 0 : index
    %5 = arith.index_cast %4 : i32 to index
    %c0_0 = arith.constant 0 : index
    %6 = vector.load %arg2[%c0, %5, %c0_0] : memref<1x72x256xbf16, #tpu.memory_space<vmem>>, vector<1x64x256xbf16>
    %7 = vector.shape_cast %6 : vector<1x64x256xbf16> to vector<64x256xbf16>
    %c0_1 = arith.constant 0 : index
    %c0_2 = arith.constant 0 : index
    %c0_3 = arith.constant 0 : index
    %8 = vector.load %arg3[%c0_1, %c0_2, %c0_3] : memref<2x256x128xbf16, #tpu.memory_space<vmem>>, vector<1x256x128xbf16>
    %9 = vector.shape_cast %8 : vector<1x256x128xbf16> to vector<256x128xbf16>
    %cst_4 = arith.constant dense<0.000000e+00> : vector<64x128xf32>
    %10 = tpu.matmul %7, %9, %cst_4 {dimension_numbers = #tpu.dot_dimension_numbers<[1], [0], [0], [1], [0, 0, 1, 1], [], []>} : vector<64x256xbf16>, vector<256x128xbf16>, vector<64x128xf32> -> vector<64x128xf32>
    %11 = arith.addf %2, %10 : vector<64x128xf32>
    %c8_i32 = arith.constant 8 : i32
    %12 = arith.addi %1, %c8_i32 : i32
    %13 = tpu.assume_multiple %12, 8 : i32
    %c0_5 = arith.constant 0 : index
    %14 = arith.index_cast %13 : i32 to index
    %c0_6 = arith.constant 0 : index
    %15 = vector.load %arg2[%c0_5, %14, %c0_6] : memref<1x72x256xbf16, #tpu.memory_space<vmem>>, vector<1x64x256xbf16>
    %16 = vector.shape_cast %15 : vector<1x64x256xbf16> to vector<64x256xbf16>
    %c1 = arith.constant 1 : index
    %c0_7 = arith.constant 0 : index
    %c0_8 = arith.constant 0 : index
    %17 = vector.load %arg3[%c1, %c0_7, %c0_8] : memref<2x256x128xbf16, #tpu.memory_space<vmem>>, vector<1x256x128xbf16>
    %18 = vector.shape_cast %17 : vector<1x256x128xbf16> to vector<256x128xbf16>
    %cst_9 = arith.constant dense<0.000000e+00> : vector<64x128xf32>
    %19 = tpu.matmul %16, %18, %cst_9 {dimension_numbers = #tpu.dot_dimension_numbers<[1], [0], [0], [1], [0, 0, 1, 1], [], []>} : vector<64x256xbf16>, vector<256x128xbf16>, vector<64x128xf32> -> vector<64x128xf32>
    %20 = arith.addf %11, %19 : vector<64x128xf32>
    %21 = arith.truncf %20 : vector<64x128xf32> to vector<64x128xbf16>
    %c0_10 = arith.constant 0 : index
    %c0_11 = arith.constant 0 : index
    %c0_12 = arith.constant 0 : index
    %22 = vector.load %arg4[%c0_10, %c0_11, %c0_12] : memref<1x64x128xbf16, #tpu.memory_space<vmem>>, vector<1x64x128xbf16>
    %23 = vector.shape_cast %22 : vector<1x64x128xbf16> to vector<64x128xbf16>
    %24 = vector.shape_cast %21 : vector<64x128xbf16> to vector<1x64x128xbf16>
    tpu.vector_store %arg4[%c0_10, %c0_11, %c0_12], %24 {strides = array<i32>} : memref<1x64x128xbf16, #tpu.memory_space<vmem>>, vector<1x64x128xbf16>,
    %25 = tpu.iota {dimensions = array<i32: 0>} : vector<64x1xi32>
    %26 = vector.broadcast %1 : i32 to vector<64x1xi32>
    %27 = arith.addi %26, %25 : vector<64x1xi32>
    %c7_i32 = arith.constant 7 : i32
    %28 = vector.broadcast %c7_i32 : i32 to vector<64x1xi32>
    %29 = arith.andi %27, %28 : vector<64x1xi32>
    %c8_i32_13 = arith.constant 8 : i32
    %30 = vector.broadcast %c8_i32_13 : i32 to vector<64x1xi32>
    %31 = arith.cmpi slt, %29, %30 : vector<64x1xi32>
    %c64_i32_14 = arith.constant 64 : i32
    %32 = vector.broadcast %c64_i32_14 : i32 to vector<64x1xi32>
    %33 = arith.cmpi slt, %27, %32 : vector<64x1xi32>
    %34 = arith.andi %31, %33 : vector<64x1xi1>
    %35 = arith.extui %34 : vector<64x1xi1> to vector<64x1xi32>
    %36 = arith.sitofp %35 : vector<64x1xi32> to vector<64x1xf32>
    %37 = vector.broadcast %36 : vector<64x1xf32> to vector<64x128xf32>
    %38 = arith.mulf %20, %37 : vector<64x128xf32>
    %cst_15 = arith.constant dense<0.000000e+00> : vector<128xf32>
    %39 = vector.multi_reduction <add>, %38, %cst_15 [0] : vector<64x128xf32> to vector<128xf32>
    %40 = vector.shape_cast %39 : vector<128xf32> to vector<1x128xf32>
    %41 = arith.mulf %38, %20 : vector<64x128xf32>
    %cst_16 = arith.constant dense<0.000000e+00> : vector<128xf32>
    %42 = vector.multi_reduction <add>, %41, %cst_16 [0] : vector<64x128xf32> to vector<128xf32>
    %43 = vector.shape_cast %42 : vector<128xf32> to vector<1x128xf32>
    %44 = tpu.concatenate %40, %43 in 0 : vector<1x128xf32>, vector<1x128xf32> -> vector<2x128xf32>
    %c0_17 = arith.constant 0 : index
    %c0_18 = arith.constant 0 : index
    %c0_19 = arith.constant 0 : index
    %c0_20 = arith.constant 0 : index
    %45 = vector.load %arg5[%c0_17, %c0_18, %c0_19, %c0_20] : memref<1x1x2x128xf32, #tpu.memory_space<vmem>>, vector<1x1x2x128xf32>
    %46 = vector.shape_cast %45 : vector<1x1x2x128xf32> to vector<2x128xf32>
    %47 = vector.shape_cast %44 : vector<2x128xf32> to vector<1x1x2x128xf32>
    tpu.vector_store %arg5[%c0_17, %c0_18, %c0_19, %c0_20], %47 {strides = array<i32>} : memref<1x1x2x128xf32, #tpu.memory_space<vmem>>, vector<1x1x2x128xf32>,
    return
  }
  func.func @transform_0(%arg0: i32, %arg1: i32) -> (i32, i32, i32) {
    %c0_i32 = arith.constant 0 : i32
    %c0_i32_0 = arith.constant 0 : i32
    %c0_i32_1 = arith.constant 0 : i32
    return %arg0, %c0_i32, %c0_i32_0 : i32, i32, i32
  }
  func.func @transform_1(%arg0: i32, %arg1: i32) -> (i32, i32, i32) {
    %c0_i32 = arith.constant 0 : i32
    %c0_i32_0 = arith.constant 0 : i32
    %c0_i32_1 = arith.constant 0 : i32
    %c0_i32_2 = arith.constant 0 : i32
    return %c0_i32, %c0_i32_0, %c0_i32_1 : i32, i32, i32
  }
  func.func @transform_2(%arg0: i32, %arg1: i32) -> (i32, i32, i32) {
    %c0_i32 = arith.constant 0 : i32
    %c0_i32_0 = arith.constant 0 : i32
    return %arg0, %arg1, %c0_i32 : i32, i32, i32
  }
  func.func @transform_3(%arg0: i32, %arg1: i32) -> (i32, i32, i32, i32) {
    %c0_i32 = arith.constant 0 : i32
    %c0_i32_0 = arith.constant 0 : i32
    %c0_i32_1 = arith.constant 0 : i32
    return %arg0, %arg1, %c0_i32, %c0_i32_0 : i32, i32, i32, i32
  }
}

module attributes {stable_mosaic.version = 11 : i64} {
  func.func @_conv_kernel(%arg0: i32, %arg1: i32, %arg2: memref<1x40x512xbf16, #tpu.memory_space<vmem>>, %arg3: memref<2x512x128xbf16, #tpu.memory_space<vmem>>, %arg4: memref<1x32x128xbf16, #tpu.memory_space<vmem>>, %arg5: memref<1x1x2x128xf32, #tpu.memory_space<vmem>>) attributes {dimension_semantics = [#tpu.dimension_semantics<parallel>, #tpu.dimension_semantics<parallel>], iteration_bounds = array<i64: 2, 1>, scalar_prefetch = 0 : i64, scratch_operands = 0 : i64, tpu.core_type = #tpu.core_type<tc>, window_params = [{transform_indices = @transform_0, window_bounds = array<i64: 1, 40, 512>}, {pipeline_mode = #tpu.pipeline_mode<synchronous>, transform_indices = @transform_1, window_bounds = array<i64: 2, 512, 128>}, {transform_indices = @transform_2, window_bounds = array<i64: 1, 32, 128>}, {transform_indices = @transform_3, window_bounds = array<i64: 1, 1, 2, 128>}]} {
    %c32_i32 = arith.constant 32 : i32
    %0 = arith.muli %arg1, %c32_i32 : i32
    %1 = tpu.assume_multiple %0, 32 : i32
    %cst = arith.constant 0.000000e+00 : f32
    %2 = vector.broadcast %cst : f32 to vector<32x128xf32>
    %c0_i32 = arith.constant 0 : i32
    %3 = arith.addi %1, %c0_i32 : i32
    %4 = tpu.assume_multiple %3, 8 : i32
    %c0 = arith.constant 0 : index
    %5 = arith.index_cast %4 : i32 to index
    %c0_0 = arith.constant 0 : index
    %6 = vector.load %arg2[%c0, %5, %c0_0] : memref<1x40x512xbf16, #tpu.memory_space<vmem>>, vector<1x32x512xbf16>
    %7 = vector.shape_cast %6 : vector<1x32x512xbf16> to vector<32x512xbf16>
    %c0_1 = arith.constant 0 : index
    %c0_2 = arith.constant 0 : index
    %c0_3 = arith.constant 0 : index
    %8 = vector.load %arg3[%c0_1, %c0_2, %c0_3] : memref<2x512x128xbf16, #tpu.memory_space<vmem>>, vector<1x512x128xbf16>
    %9 = vector.shape_cast %8 : vector<1x512x128xbf16> to vector<512x128xbf16>
    %cst_4 = arith.constant dense<0.000000e+00> : vector<32x128xf32>
    %10 = tpu.matmul %7, %9, %cst_4 {dimension_numbers = #tpu.dot_dimension_numbers<[1], [0], [0], [1], [0, 0, 1, 1], [], []>} : vector<32x512xbf16>, vector<512x128xbf16>, vector<32x128xf32> -> vector<32x128xf32>
    %11 = arith.addf %2, %10 : vector<32x128xf32>
    %c8_i32 = arith.constant 8 : i32
    %12 = arith.addi %1, %c8_i32 : i32
    %13 = tpu.assume_multiple %12, 8 : i32
    %c0_5 = arith.constant 0 : index
    %14 = arith.index_cast %13 : i32 to index
    %c0_6 = arith.constant 0 : index
    %15 = vector.load %arg2[%c0_5, %14, %c0_6] : memref<1x40x512xbf16, #tpu.memory_space<vmem>>, vector<1x32x512xbf16>
    %16 = vector.shape_cast %15 : vector<1x32x512xbf16> to vector<32x512xbf16>
    %c1 = arith.constant 1 : index
    %c0_7 = arith.constant 0 : index
    %c0_8 = arith.constant 0 : index
    %17 = vector.load %arg3[%c1, %c0_7, %c0_8] : memref<2x512x128xbf16, #tpu.memory_space<vmem>>, vector<1x512x128xbf16>
    %18 = vector.shape_cast %17 : vector<1x512x128xbf16> to vector<512x128xbf16>
    %cst_9 = arith.constant dense<0.000000e+00> : vector<32x128xf32>
    %19 = tpu.matmul %16, %18, %cst_9 {dimension_numbers = #tpu.dot_dimension_numbers<[1], [0], [0], [1], [0, 0, 1, 1], [], []>} : vector<32x512xbf16>, vector<512x128xbf16>, vector<32x128xf32> -> vector<32x128xf32>
    %20 = arith.addf %11, %19 : vector<32x128xf32>
    %21 = arith.truncf %20 : vector<32x128xf32> to vector<32x128xbf16>
    %c0_10 = arith.constant 0 : index
    %c0_11 = arith.constant 0 : index
    %c0_12 = arith.constant 0 : index
    %22 = vector.load %arg4[%c0_10, %c0_11, %c0_12] : memref<1x32x128xbf16, #tpu.memory_space<vmem>>, vector<1x32x128xbf16>
    %23 = vector.shape_cast %22 : vector<1x32x128xbf16> to vector<32x128xbf16>
    %24 = vector.shape_cast %21 : vector<32x128xbf16> to vector<1x32x128xbf16>
    tpu.vector_store %arg4[%c0_10, %c0_11, %c0_12], %24 {strides = array<i32>} : memref<1x32x128xbf16, #tpu.memory_space<vmem>>, vector<1x32x128xbf16>,
    %25 = tpu.iota {dimensions = array<i32: 0>} : vector<32x1xi32>
    %26 = vector.broadcast %1 : i32 to vector<32x1xi32>
    %27 = arith.addi %26, %25 : vector<32x1xi32>
    %c7_i32 = arith.constant 7 : i32
    %28 = vector.broadcast %c7_i32 : i32 to vector<32x1xi32>
    %29 = arith.andi %27, %28 : vector<32x1xi32>
    %c4_i32 = arith.constant 4 : i32
    %30 = vector.broadcast %c4_i32 : i32 to vector<32x1xi32>
    %31 = arith.cmpi slt, %29, %30 : vector<32x1xi32>
    %c32_i32_13 = arith.constant 32 : i32
    %32 = vector.broadcast %c32_i32_13 : i32 to vector<32x1xi32>
    %33 = arith.cmpi slt, %27, %32 : vector<32x1xi32>
    %34 = arith.andi %31, %33 : vector<32x1xi1>
    %35 = arith.extui %34 : vector<32x1xi1> to vector<32x1xi32>
    %36 = arith.sitofp %35 : vector<32x1xi32> to vector<32x1xf32>
    %37 = vector.broadcast %36 : vector<32x1xf32> to vector<32x128xf32>
    %38 = arith.mulf %20, %37 : vector<32x128xf32>
    %cst_14 = arith.constant dense<0.000000e+00> : vector<128xf32>
    %39 = vector.multi_reduction <add>, %38, %cst_14 [0] : vector<32x128xf32> to vector<128xf32>
    %40 = vector.shape_cast %39 : vector<128xf32> to vector<1x128xf32>
    %41 = arith.mulf %38, %20 : vector<32x128xf32>
    %cst_15 = arith.constant dense<0.000000e+00> : vector<128xf32>
    %42 = vector.multi_reduction <add>, %41, %cst_15 [0] : vector<32x128xf32> to vector<128xf32>
    %43 = vector.shape_cast %42 : vector<128xf32> to vector<1x128xf32>
    %44 = tpu.concatenate %40, %43 in 0 : vector<1x128xf32>, vector<1x128xf32> -> vector<2x128xf32>
    %c0_16 = arith.constant 0 : index
    %c0_17 = arith.constant 0 : index
    %c0_18 = arith.constant 0 : index
    %c0_19 = arith.constant 0 : index
    %45 = vector.load %arg5[%c0_16, %c0_17, %c0_18, %c0_19] : memref<1x1x2x128xf32, #tpu.memory_space<vmem>>, vector<1x1x2x128xf32>
    %46 = vector.shape_cast %45 : vector<1x1x2x128xf32> to vector<2x128xf32>
    %47 = vector.shape_cast %44 : vector<2x128xf32> to vector<1x1x2x128xf32>
    tpu.vector_store %arg5[%c0_16, %c0_17, %c0_18, %c0_19], %47 {strides = array<i32>} : memref<1x1x2x128xf32, #tpu.memory_space<vmem>>, vector<1x1x2x128xf32>,
    return
  }
  func.func @transform_0(%arg0: i32, %arg1: i32) -> (i32, i32, i32) {
    %c0_i32 = arith.constant 0 : i32
    %c0_i32_0 = arith.constant 0 : i32
    %c0_i32_1 = arith.constant 0 : i32
    return %arg0, %c0_i32, %c0_i32_0 : i32, i32, i32
  }
  func.func @transform_1(%arg0: i32, %arg1: i32) -> (i32, i32, i32) {
    %c0_i32 = arith.constant 0 : i32
    %c0_i32_0 = arith.constant 0 : i32
    %c0_i32_1 = arith.constant 0 : i32
    %c0_i32_2 = arith.constant 0 : i32
    return %c0_i32, %c0_i32_0, %c0_i32_1 : i32, i32, i32
  }
  func.func @transform_2(%arg0: i32, %arg1: i32) -> (i32, i32, i32) {
    %c0_i32 = arith.constant 0 : i32
    %c0_i32_0 = arith.constant 0 : i32
    return %arg0, %arg1, %c0_i32 : i32, i32, i32
  }
  func.func @transform_3(%arg0: i32, %arg1: i32) -> (i32, i32, i32, i32) {
    %c0_i32 = arith.constant 0 : i32
    %c0_i32_0 = arith.constant 0 : i32
    %c0_i32_1 = arith.constant 0 : i32
    return %arg0, %arg1, %c0_i32, %c0_i32_0 : i32, i32, i32, i32
  }
}

module attributes {stable_mosaic.version = 11 : i64} {
  func.func @_head_kernel(%arg0: i32, %arg1: memref<2x32x128xbf16, #tpu.memory_space<vmem>>, %arg2: memref<1x1x128xf32, #tpu.memory_space<vmem>>, %arg3: memref<1x1x128xf32, #tpu.memory_space<vmem>>, %arg4: memref<32x128xf32, #tpu.memory_space<vmem>>, %arg5: memref<2x1xf32, #tpu.memory_space<vmem>>) attributes {dimension_semantics = [#tpu.dimension_semantics<parallel>], iteration_bounds = array<i64: 1>, scalar_prefetch = 0 : i64, scratch_operands = 0 : i64, tpu.core_type = #tpu.core_type<tc>, window_params = [{transform_indices = @transform_0, window_bounds = array<i64: 2, 32, 128>}, {pipeline_mode = #tpu.pipeline_mode<synchronous>, transform_indices = @transform_1, window_bounds = array<i64: 1, 1, 128>}, {pipeline_mode = #tpu.pipeline_mode<synchronous>, transform_indices = @transform_2, window_bounds = array<i64: 1, 1, 128>}, {pipeline_mode = #tpu.pipeline_mode<synchronous>, transform_indices = @transform_3, window_bounds = array<i64: 32, 128>}, {transform_indices = @transform_4, window_bounds = array<i64: 2, 1>}]} {
    %c0 = arith.constant 0 : index
    %c0_0 = arith.constant 0 : index
    %c0_1 = arith.constant 0 : index
    %0 = vector.load %arg1[%c0, %c0_0, %c0_1] : memref<2x32x128xbf16, #tpu.memory_space<vmem>>, vector<2x32x128xbf16>
    %1 = arith.extf %0 : vector<2x32x128xbf16> to vector<2x32x128xf32>
    %c0_2 = arith.constant 0 : index
    %c0_3 = arith.constant 0 : index
    %c0_4 = arith.constant 0 : index
    %2 = vector.load %arg2[%c0_2, %c0_3, %c0_4] : memref<1x1x128xf32, #tpu.memory_space<vmem>>, vector<1x1x128xf32>
    %3 = vector.broadcast %2 : vector<1x1x128xf32> to vector<2x32x128xf32>
    %4 = arith.mulf %1, %3 : vector<2x32x128xf32>
    %c0_5 = arith.constant 0 : index
    %c0_6 = arith.constant 0 : index
    %c0_7 = arith.constant 0 : index
    %5 = vector.load %arg3[%c0_5, %c0_6, %c0_7] : memref<1x1x128xf32, #tpu.memory_space<vmem>>, vector<1x1x128xf32>
    %6 = vector.broadcast %5 : vector<1x1x128xf32> to vector<2x32x128xf32>
    %7 = arith.addf %4, %6 : vector<2x32x128xf32>
    %cst = arith.constant 0.000000e+00 : f32
    %8 = vector.broadcast %cst : f32 to vector<2x32x128xf32>
    %9 = arith.cmpf oge, %7, %8 : vector<2x32x128xf32>
    %cst_8 = arith.constant 2.000000e-01 : f32
    %10 = vector.broadcast %cst_8 : f32 to vector<2x32x128xf32>
    %11 = arith.mulf %10, %7 : vector<2x32x128xf32>
    %12 = arith.select %9, %7, %11 : vector<2x32x128xi1>, vector<2x32x128xf32>
    %c0_9 = arith.constant 0 : index
    %c0_10 = arith.constant 0 : index
    %13 = vector.load %arg4[%c0_9, %c0_10] : memref<32x128xf32, #tpu.memory_space<vmem>>, vector<32x128xf32>
    %14 = vector.shape_cast %13 : vector<32x128xf32> to vector<1x32x128xf32>
    %15 = vector.broadcast %14 : vector<1x32x128xf32> to vector<2x32x128xf32>
    %16 = arith.mulf %12, %15 : vector<2x32x128xf32>
    %cst_11 = arith.constant dense<0.000000e+00> : vector<2x32xf32>
    %17 = vector.multi_reduction <add>, %16, %cst_11 [2] : vector<2x32x128xf32> to vector<2x32xf32>
    %cst_12 = arith.constant dense<0.000000e+00> : vector<2xf32>
    %18 = vector.multi_reduction <add>, %17, %cst_12 [1] : vector<2x32xf32> to vector<2xf32>
    %19 = vector.shape_cast %18 : vector<2xf32> to vector<2x1xf32>
    %20 = arith.negf %19 : vector<2x1xf32>
    %21 = math.exp %20 : vector<2x1xf32>
    %cst_13 = arith.constant 1.000000e+00 : f32
    %22 = vector.broadcast %cst_13 : f32 to vector<2x1xf32>
    %23 = arith.addf %22, %21 : vector<2x1xf32>
    %24 = arith.divf %22, %23 : vector<2x1xf32>
    %c0_14 = arith.constant 0 : index
    %c0_15 = arith.constant 0 : index
    %25 = vector.load %arg5[%c0_14, %c0_15] : memref<2x1xf32, #tpu.memory_space<vmem>>, vector<2x1xf32>
    tpu.vector_store %arg5[%c0_14, %c0_15], %24 {strides = array<i32>} : memref<2x1xf32, #tpu.memory_space<vmem>>, vector<2x1xf32>,
    return
  }
  func.func @transform_0(%arg0: i32) -> (i32, i32, i32) {
    %c0_i32 = arith.constant 0 : i32
    %c0_i32_0 = arith.constant 0 : i32
    %c0_i32_1 = arith.constant 0 : i32
    return %arg0, %c0_i32, %c0_i32_0 : i32, i32, i32
  }
  func.func @transform_1(%arg0: i32) -> (i32, i32, i32) {
    %c0_i32 = arith.constant 0 : i32
    %c0_i32_0 = arith.constant 0 : i32
    %c0_i32_1 = arith.constant 0 : i32
    %c0_i32_2 = arith.constant 0 : i32
    return %c0_i32, %c0_i32_0, %c0_i32_1 : i32, i32, i32
  }
  func.func @transform_2(%arg0: i32) -> (i32, i32, i32) {
    %c0_i32 = arith.constant 0 : i32
    %c0_i32_0 = arith.constant 0 : i32
    %c0_i32_1 = arith.constant 0 : i32
    %c0_i32_2 = arith.constant 0 : i32
    return %c0_i32, %c0_i32_0, %c0_i32_1 : i32, i32, i32
  }
  func.func @transform_3(%arg0: i32) -> (i32, i32) {
    %c0_i32 = arith.constant 0 : i32
    %c0_i32_0 = arith.constant 0 : i32
    %c0_i32_1 = arith.constant 0 : i32
    return %c0_i32, %c0_i32_0 : i32, i32
  }
  func.func @transform_4(%arg0: i32) -> (i32, i32) {
    %c0_i32 = arith.constant 0 : i32
    %c0_i32_0 = arith.constant 0 : i32
    return %arg0, %c0_i32 : i32, i32
  }
}

</mosaic_0001>

<bundles_post_ra>
// kernel: discriminator_forward.5
= control target key start
LH: loop header
LB: loop body
LE: loop exit
PB: predicated region body
PF: predicated region fallthrough
CT: control target
= control target key end

     0   :  { %9 = vsyncpa [#allocation3], 0  ;;  %s1207_s0 = inlined_call_operand.vmem [shape: bf16[2,1024,48], index: 0, kind: input, shape index: {}]   ;;  %s1208_s1 = inlined_call_operand.vmem [shape: bf16[1,48,128], index: 1, kind: input, shape index: {}]   ;;  %s1209_s2 = inlined_call_operand.vmem [shape: bf16[2,1024,128], index: 2, kind: output, shape index: {0}]   ;;  %s1210_s3 = inlined_call_operand.hbm [shape: f32[2,8,2,128], index: 3, kind: output, shape index: {1}]  }
   0x1   :  { %11 = vsyncpa [#allocation3 + $0x1], 0  ;;  %s1041_s12 = smov 0   ;;  %s1043_s13 = smov 0  }
   0x2   :  { %s1045_s14 = smov 0   ;;  %s1047_s15 = smov 0  }
   0x3   :  { %s1049_s16 = smov 0   ;;  %s1051_s17 = smov 0  }
   0x4   :  { %s1053_s18 = smov 0   ;;  %s1055_s19 = smov 0  }
   0x5 LB: > { %s684_s20 = sadd.s32 4294967295, %s1017_s19   ;;  %s685_s21 = sadd.s32 4294967294, %s1017_s19   ;;  %s1017_s19 = sphi %s1055_s19, %s17_s19   ;;  %s1013_s18 = sphi %s1053_s18, %s1219_s18   ;;  %s1009_s17 = sphi %s1051_s17, %s1218_s17   ;;  %s1005_s16 = sphi %s1049_s16, %s1217_s16   ;;  %s1001_s15 = sphi %s1047_s15, %s1216_s15   ;;  %s997_s14 = sphi %s1045_s14, %s1215_s14   ;;  %s993_s13 = sphi %s1043_s13, %s1214_s13   ;;  %s989_s12 = sphi %s1041_s12, %s1213_s12  }
   0x6   : > { %s26_s22 = sadd.s32 1, %s1009_s17  ;;  %s29_s23 = sadd.s32 1, %s1013_s18 }
   0x7   : > { %p27_p0 = scmp.ge.s32.totalorder %s26_s22, 8  ;;  %p123_p1 = scmp.ne.s32.totalorder %s997_s14, %s993_s13 }
   0x8   : > { %p124_p2 = scmp.eq.s32.totalorder %s684_s20, 15  ;;  %p129_p5 = scmp.ne.s32.totalorder %s993_s13, %s989_s12 }
   0x9   : > { %s1221_s22 = smov (%p27_p0, %s26_s22), 0  ;;  %s1223_s23 = smov (!%p27_p0, %s29_s23), %s1013_s18 }
   0xa   : > { %s109_s24 = ssub.s32 %s1009_s17, %s1221_s22  ;;  %p1092_p3 = por %p124_p2, %p123_p1 }
   0xb   : > { %p31_p4 = scmp.ge.s32.totalorder %s1223_s23, 2  ;;  %p130_p6 = scmp.eq.s32.totalorder %s685_s21, 15 }
   0xc   : > { %p688_p7 = scmp.ge.s32.totalorder %s1017_s19, 1  ;;  %p159_p9 = scmp.lt.s32.totalorder %s1017_s19, 17 }
   0xd   : > { %s1225_s23 = smov (%p31_p4, %s1223_s23), 0  ;;  %p1101_p8 = por %p130_p6, %p129_p5 }
   0xe   : > { %s108_s27 = ssub.s32 %s1013_s18, %s1225_s23  ;;  %s113_s28 = sadd.s32 1, %s997_s14 }
   0xf   : > { %s110_s29 = sor.u32 %s109_s24, %s108_s27  ;;  %p160_p10 = pnand %p688_p7, %p159_p9 }
  0x10   : > { %p111_p11 = scmp.eq.s32.totalorder %s110_s29, 0  ;;  %v912_v0 = vld [vmem:[%s1208_s1] sm:$0xff] (!%p160_p10)   ;;  %p192_p12 = scmp.lt.s32.totalorder (!%p160_p10), %s1005_s16, 1  ;;  %v913_v1 = vld [vmem:[%s1208_s1 + $0x8] sm:$0xff] (!%p160_p10)   ;;  %v914_v2 = vld [vmem:[%s1208_s1 + $0x10] sm:$0xff] (!%p160_p10)   ;;  %vm293_vm0 = vcmask (!%p160_p10), 392192  }
  0x11   : > { %163 = sbr.rel (%p160_p10) target bundleno = 262 (0x106), region = 28  ;;  %s695_s8 = sshll.u32 (!%p160_p10), %s1001_s15, 7  ;;  %812 = vmatprep.subr.bf16.mxu0 (!%p160_p10), %v912_v0  ;;  %834 = vmatprep.subr.bf16.mxu1 (!%p160_p10), %v912_v0  ;;  %v1019_v11 = vmov (!%p160_p10), 0.0  }
  0x12   : > { %s1110_s30 = scalar_select %p111_p11, %s997_s14, %s113_s28  }
  0x13   : > { %813 = vmatpush3.bf16.msra.mxu0 (!%p160_p10), %v912_v0  ;;  %837 = vmatpush3.bf16.msra.mxu1 (!%p160_p10), %v912_v0  ;;  %s209_s10 = sshra.s32 (!%p160_p10), %s695_s8, 3  ;;  %s189_s5 = sand.u32 (!%p160_p10), 1, %s993_s13  }
  0x14   : > { %814 = vmatprep.subr.bf16.mxu0 (!%p160_p10), %v913_v1  ;;  %835 = vmatprep.subr.bf16.mxu1 (!%p160_p10), %v913_v1  ;;  %s696_s24 = sshll.u32 (!%p160_p10), %s209_s10, 2  ;;  %s689_s6 = sshll.u32 (!%p160_p10), %s189_s5, 1 }
  0x15   : > { %s733_s7 = sshll.u32 (!%p160_p10), %s1005_s16, 3  ;;  %s191_s11 = scalar_lea.vmem (!%p160_p10), [#allocation2], %s689_s6 }
  0x16   : > { %s569_s8 = sadd.s32 (!%p160_p10), %s1001_s15, %s733_s7  ;;  %s573_s20 = sshll.u32 (!%p160_p10), %s191_s11, 4  ;;  %543 = vst [vmem:[%s191_s11] sm:$0x3] (!%p160_p10), %v1019_v11  ;;  %s574_s20 = int_to_ptr.vmem [resolvable:$true] %s573_s20 }
  0x17   : > { %815 = vmatpush3.bf16.msra.mxu0 (!%p160_p10), %v913_v1  ;;  %838 = vmatpush3.bf16.msra.mxu1 (!%p160_p10), %v913_v1  ;;  %s734_s10 = sshll.u32 (!%p160_p10), %s569_s8, 5  ;;  %s554_s28 = scalar_lea.sflag (!%p160_p10), [#allocation3], %s189_s5 }
  0x18   : > { %s1121_s9 = scalar_select %p192_p12, %s1005_s16, 1  ;;  %816 = vmatprep.subr.bf16.mxu0 %v914_v2  ;;  %836 = vmatprep.subr.bf16.mxu1 %v914_v2 }
  0x19   : > { %s1144_s27 = scalar_lea.hbm %s1210_s3, %s734_s10 }
  0x1a   : > { %s737_s21 = sshll.u32 %s1121_s9, 9 }
  0x1b   : > { %s196_s29 = scalar_lea.vmem %s1207_s0, %s737_s21  ;;  %817 = vmatpush3.bf16.msra.mxu0 %v914_v2  ;;  %839 = vmatpush3.bf16.msra.mxu1 %v914_v2 }
  0x1c   : > { %s212_s4 = scalar_lea.vmem %s196_s29, %s696_s24  ;;  %s923_s29 = scalar_lea.vmem %s574_s20, 32 }
  0x1d   : > { %v915_v3 = vld [vmem:[%s212_s4] sm:$0xff]   ;;  %v917_v5 = vld [vmem:[%s212_s4 + $0x8] sm:$0xff]   ;;  %v919_v7 = vld [vmem:[%s212_s4 + $0x10] sm:$0xff]   ;;  %p924_p13 = scmp.ne.s32.totalorder %s574_s20, %s923_s29 }
  0x1e   : > { %v916_v4 = vld [vmem:[%s212_s4 + $0x20] sm:$0xff]   ;;  %818 = vmatprep.mubr.msk.bf16.mxu0 %vm293_vm0, %v915_v3  ;;  %v918_v6 = vld [vmem:[%s212_s4 + $0x28] sm:$0xff]   ;;  %v920_v8 = vld [vmem:[%s212_s4 + $0x30] sm:$0xff]  }
  0x1f   : > { %826 = vmatprep.mubr.msk.bf16.mxu1 %vm293_vm0, %v916_v4  ;;  %819 = vmatmul.mubr.msk.bf16.vlgmr.msra.gmra.mrb[0].mxu0 %vm293_vm0, %v917_v5  ;;  %v921_v9 = vld [vmem:[%s212_s4 + $0x18] sm:$0xff]   ;;  %p925_p0 = pnand %p924_p13, %p1092_p3 }
  0x20   : > { %827 = vmatmul.mubr.msk.bf16.vlgmr.msra.gmra.mrb[0].mxu1 %vm293_vm0, %v918_v6  ;;  %822 = vmatprep.mubr.msk.bf16.mxu0 %vm293_vm0, %v919_v7  ;;  %v922_v10 = vld [vmem:[%s212_s4 + $0x38] sm:$0xff]   ;;  %s1020_s4 = smov [#allocation2]  }
  0x21   : > { %830 = vmatprep.mubr.msk.bf16.mxu1 %vm293_vm0, %v920_v8  ;;  %p926_p1 = pneg %p925_p0  ;;  %s927_s16 = sshll.u32 %s1020_s4, 4  ;;  %s928_s16 = int_to_ptr.vmem [resolvable:$false] %s927_s16 }
  0x22   : > { %s929_s7 = scalar_lea.vmem %s928_s16, 64  ;;  %p930_p2 = scmp.lt.s32.totalorder %s574_s20, %s928_s16 }
  0x23   : > { %p931_p4 = scmp.lt.s32.totalorder %s929_s7, %s923_s29 }
  0x25   : > { %p932_p5 = por %p931_p4, %p930_p2 }
  0x27   : > { %823 = vmatmul.mubr.msk.bf16.gmra.mrb[4].mxu0 %vm293_vm0, %v921_v9  ;;  %p933_p6 = pnand %p932_p5, %p926_p1 }
  0x28   : > { %831 = vmatmul.mubr.msk.bf16.gmra.mrb[4].mxu1 %vm293_vm0, %v922_v10 }
  0x29   : > { %936 = shalt.err (!%p933_p6)
}
  0x2a   : > { %s937_s5 = scalar_lea.hbm %s1144_s27, 32  ;;  %s941_s10 = scalar_lea.hbm %s1210_s3, 512 }
  0x2b   : > { %p938_p7 = scmp.ne.s32.totalorder %s1144_s27, %s937_s5  ;;  %p942_p11 = scmp.lt.u32.totalorder %s1144_s27, %s1210_s3 }
  0x2c   : > { %p943_p12 = scmp.lt.u32.totalorder %s941_s10, %s937_s5  ;;  %p945_p0 = scmp.lt.u32.totalorder %s937_s5, %s1144_s27 }
  0x2d   : > { %p939_p9 = pnand %p938_p7, %p1092_p3 }
  0x2e   : > { %p944_p13 = por %p943_p12, %p942_p11 }
  0x2f   : > { %p940_p10 = pneg %p939_p9 }
  0x30   : > { %p946_p1 = por %p945_p0, %p944_p13 }
  0x32   : > { %p947_p2 = pnand %p946_p1, %p940_p10 }
  0x34   : > { %950 = shalt.err (!%p947_p2)
}
  0x35   : > { %840 = dma.vmem_to_hbm [thread:$0]  (%p1092_p3), %s574_s20, 32, %s1144_s27, %s554_s28  }
  0x36   : > { %s692_s24 = sshll.u32 %s1001_s15, 4  ;;  %s693_s29 = sshll.u32 %s1121_s9, 7 }
  0x37   : > { %p200_p4 = scmp.lt.s32.totalorder %s692_s24, 127 }
  0x39   : > { %s1227_s24 = smov (!%p200_p4, %s692_s24), 127 }
  0x3a   : > { %s203_s4 = sadd.s32 %s693_s29, %s1227_s24 }
  0x3b   : > { %s694_s16 = sshll.u32 %s203_s4, 2 }
  0x3c   : > { %s1168_s9 = scalar_lea.vmem %s1209_s2, %s694_s16 }
  0xf2   : > { %v820_v12 = vpop.f32.mrb[0].mxu0 }
  0xf3   : > { %v828_v13 = vpop.f32.mrb[0].mxu1  ;;  %vm417_vm1 = vcmp.ge.f32.partialorder %v820_v12, 0.0  ;;  %v433_v14 = vmul.f32 0.2, %v820_v12  ;;  %v352_v16 = vpop.f32.mrb[1].mxu0 }
  0xf4   : > { %v441_v15 = vmul.f32 0.2, %v828_v13  ;;  %vm425_vm2 = vcmp.ge.f32.partialorder %v828_v13, 0.0  ;;  %v384_v17 = vpop.f32.mrb[1].mxu1  ;;  %v431_v18 = vmul.f32 0.2, %v352_v16 }
  0xf5   : > { %v821_v19 = vpop.f32.mrb[2].mxu0  ;;  %v829_v20 = vpop.f32.mrb[2].mxu1  ;;  %v449_v21 = vsel %vm417_vm1, %v820_v12, %v433_v14  ;;  %v439_v22 = vmul.f32 0.2, %v384_v17  ;;  %vm415_vm4 = vcmp.ge.f32.partialorder %v352_v16, 0.0  ;;  %vm423_vm6 = vcmp.ge.f32.partialorder %v384_v17, 0.0 }
  0xf6   : > { %vm418_vm3 = vcmp.ge.f32.partialorder %v821_v19, 0.0  ;;  %v434_v23 = vmul.f32 0.2, %v821_v19  ;;  %v457_v24 = vsel %vm425_vm2, %v828_v13, %v441_v15  ;;  %vm426_vm5 = vcmp.ge.f32.partialorder %v829_v20, 0.0  ;;  %v355_v26 = vpop.f32.mrb[3].mxu0  ;;  %v387_v27 = vpop.f32.mrb[3].mxu1 }
  0xf7   : > { %v442_v25 = vmul.f32 0.2, %v829_v20  ;;  %vm416_vm7 = vcmp.ge.f32.partialorder %v355_v26, 0.0  ;;  %v432_v29 = vmul.f32 0.2, %v355_v26  ;;  %vm424_vm8 = vcmp.ge.f32.partialorder %v387_v27, 0.0 }
  0xf8   : > { %v450_v28 = vsel %vm418_vm3, %v821_v19, %v434_v23  ;;  %v440_v32 = vmul.f32 0.2, %v387_v27  ;;  %v447_v33 = vsel %vm415_vm4, %v352_v16, %v431_v18  ;;  %v455_v38 = vsel %vm423_vm6, %v384_v17, %v439_v22 }
  0xf9   : > { %v762_v30 = vpack.c.bf16 %v450_v28, %v449_v21  ;;  %v458_v31 = vsel %vm426_vm5, %v829_v20, %v442_v25  ;;  %v448_v35 = vsel %vm416_vm7, %v355_v26, %v432_v29 }
  0xfa   : > { %v782_v34 = vpack.c.bf16 %v458_v31, %v457_v24  ;;  %v824_v36 = vpop.f32.mrb[4].mxu0  ;;  %v757_v39 = vpack.c.bf16 %v448_v35, %v447_v33  ;;  %v456_v40 = vsel %vm424_vm8, %v387_v27, %v440_v32 }
  0xfb   : > { %v832_v37 = vpop.f32.mrb[4].mxu1  ;;  %794 = vst [vmem:[%s1168_s9 + $0x8] sm:$0xff] %v762_v30   ;;  %v437_v41 = vmul.f32 0.2, %v824_v36  ;;  %v368_v42 = vpop.f32.mrb[5].mxu0  ;;  %v777_v44 = vpack.c.bf16 %v456_v40, %v455_v38  ;;  %vm421_vm9 = vcmp.ge.f32.partialorder %v824_v36, 0.0 }
  0xfc   : > { %v400_v43 = vpop.f32.mrb[5].mxu1  ;;  %798 = vst [vmem:[%s1168_s9 + $0x28] sm:$0xff] %v782_v34   ;;  %v445_v45 = vmul.f32 0.2, %v832_v37  ;;  %v825_v46 = vpop.f32.mrb[6].mxu0  ;;  %758 = vst [vmem:[%s1168_s9] sm:$0xff] %v757_v39   ;;  %vm429_vm10 = vcmp.ge.f32.partialorder %v832_v37, 0.0 }
  0xfd   : > { %v833_v47 = vpop.f32.mrb[6].mxu1  ;;  %v435_v48 = vmul.f32 0.2, %v368_v42  ;;  %v443_v49 = vmul.f32 0.2, %v400_v43  ;;  %v371_v50 = vpop.f32.mrb[7].mxu0  ;;  %v453_v53 = vsel %vm421_vm9, %v824_v36, %v437_v41 }
  0xfe   : > { %797 = vst [vmem:[%s1168_s9 + $0x20] sm:$0xff] %v777_v44   ;;  %vm419_vm11 = vcmp.ge.f32.partialorder %v368_v42, 0.0  ;;  %vm422_vm12 = vcmp.ge.f32.partialorder %v825_v46, 0.0  ;;  %v438_v51 = vmul.f32 0.2, %v825_v46  ;;  %vm430_vm13 = vcmp.ge.f32.partialorder %v833_v47, 0.0 }
  0xff   : > { %v403_v52 = vpop.f32.mrb[7].mxu1  ;;  %vm427_vm14 = vcmp.ge.f32.partialorder %v400_v43, 0.0  ;;  %v446_v54 = vmul.f32 0.2, %v833_v47  ;;  %vm420_vm15 = vcmp.ge.f32.partialorder %v371_v50, 0.0  ;;  %v461_v58 = vsel %vm429_vm10, %v832_v37, %v445_v45 }
 0x100   : > { %v454_v55 = vsel %vm422_vm12, %v825_v46, %v438_v51  ;;  %v436_v56 = vmul.f32 0.2, %v371_v50  ;;  %vm428_vm0 = vcmp.ge.f32.partialorder %v403_v52, 0.0  ;;  %v444_v57 = vmul.f32 0.2, %v403_v52 }
 0x101   : > { %v451_v59 = vsel %vm419_vm11, %v368_v42, %v435_v48  ;;  %v772_v60 = vpack.c.bf16 %v454_v55, %v453_v53  ;;  %v462_v61 = vsel %vm430_vm13, %v833_v47, %v446_v54  ;;  %v459_v62 = vsel %vm427_vm14, %v400_v43, %v443_v49 }
 0x102   : > { %v792_v63 = vpack.c.bf16 %v462_v61, %v461_v58  ;;  %v452_v0 = vsel %vm420_vm15, %v371_v50, %v436_v56  ;;  %v460_v1 = vsel %vm428_vm0, %v403_v52, %v444_v57 }
 0x103   : > { %796 = vst [vmem:[%s1168_s9 + $0x18] sm:$0xff] %v772_v60   ;;  %v767_v2 = vpack.c.bf16 %v452_v0, %v451_v59  ;;  %v787_v3 = vpack.c.bf16 %v460_v1, %v459_v62 }
 0x104   : > { %800 = vst [vmem:[%s1168_s9 + $0x38] sm:$0xff] %v792_v63  }
 0x105   : > { %795 = vst [vmem:[%s1168_s9 + $0x10] sm:$0xff] %v767_v2   ;;  %799 = vst [vmem:[%s1168_s9 + $0x30] sm:$0xff] %v787_v3  }
 0x106 PF: > { %p846_p3 = scmp.ge.s32.totalorder %s1017_s19, 2  ;;  %s597_s20 = sand.u32 1, %s989_s12  }
 0x107   : > { %s598_s27 = scalar_lea.sflag [#allocation3], %s597_s20 }
 0x108   : > { %p843_p5 = pnand %p846_p3, %p1101_p8 }
 0x10a   : > { %984 = dma.done.wait (!%p843_p5), %s598_s27, 32  }
 0x10b   : > { %986 = vsyncadd (!%p843_p5), %s598_s27, 4294967264  ;;  %s17_s19 = sadd.s32 1, %s1017_s19   ;;  %s1213_s12 = smov %s993_s13 }
 0x10c   : > { %p14_p6 = scmp.ge.s32.totalorder %s17_s19, 18   ;;  %s1214_s13 = smov %s997_s14 }
 0x10d   : > { %s1215_s14 = smov %s1110_s30  ;;  %s1216_s15 = smov %s1009_s17 }
 0x10e   : > { %s1217_s16 = smov %s1013_s18  ;;  %s1218_s17 = smov %s1221_s22 }
 0x10f   : > { %s1219_s18 = smov %s1225_s23  ;;  %16 = sbr.rel (!%p14_p6) target bundleno = 5 (0x5), region = 76 }
 0x116   :  { %603 = vsyncpa [#allocation3], 1 }
 0x117   :  { %605 = vsyncpa [#allocation3 + $0x1], 1 }

// kernel: discriminator_forward.6
= control target key start
LH: loop header
LB: loop body
LE: loop exit
PB: predicated region body
PF: predicated region fallthrough
CT: control target
= control target key end

     0   :  { %s1505_s12 = smov 0   ;;  %s1507_s13 = smov 0   ;;  %s1896_s0 = inlined_call_operand.vmem [shape: bf16[2,272,128], index: 0, kind: input, shape index: {}]   ;;  %s1897_s1 = inlined_call_operand.vmem [shape: bf16[2,128,128], index: 1, kind: input, shape index: {}]   ;;  %s1898_s2 = inlined_call_operand.vmem [shape: bf16[2,256,128], index: 2, kind: output, shape index: {0}]   ;;  %s1899_s3 = inlined_call_operand.vmem [shape: f32[2,2,2,128], index: 3, kind: output, shape index: {1}]  }
   0x1   :  { %s1509_s14 = smov 0   ;;  %s1511_s15 = smov 0  }
   0x2   :  { %s1513_s16 = smov 0  }
   0x3 LB: > { %s23_s17 = sadd.s32 1, %s1474_s14  ;;  %s26_s18 = sadd.s32 1, %s1478_s15  ;;  %s1482_s16 = sphi %s1513_s16, %s14_s16   ;;  %s1478_s15 = sphi %s1511_s15, %s1948_s15   ;;  %s1474_s14 = sphi %s1509_s14, %s1947_s14   ;;  %s1470_s13 = sphi %s1507_s13, %s1946_s13   ;;  %s1466_s12 = sphi %s1505_s12, %s1945_s12  }
   0x4   : > { %p24_p0 = scmp.ge.s32.totalorder %s23_s17, 2  ;;  %p1103_p1 = scmp.ge.s32.totalorder %s1482_s16, 1 }
   0x5   : > { %p156_p2 = scmp.lt.s32.totalorder %s1482_s16, 5 }
   0x6   : > { %s1950_s17 = smov (%p24_p0, %s23_s17), 0  ;;  %s1952_s18 = smov (!%p24_p0, %s26_s18), %s1478_s15 }
   0x7   : > { %p157_p3 = pnand %p1103_p1, %p156_p2  ;;  %p28_p4 = scmp.ge.s32.totalorder %s1952_s18, 2 }
   0x8   : > { %v1412_v0 = vld [vmem:[%s1897_s1 + $0x40] sm:$0xff] (!%p157_p3)   ;;  %p192_p5 = scmp.lt.s32.totalorder (!%p157_p3), %s1470_s13, 1  ;;  %s1544_s23 = sshll.u32 (!%p157_p3), %s1466_s12, 7  ;;  %v1414_v2 = vld [vmem:[%s1897_s1 + $0x48] sm:$0xff] (!%p157_p3)   ;;  %v1416_v4 = vld [vmem:[%s1897_s1 + $0x50] sm:$0xff] (!%p157_p3)   ;;  %v757_v32 = vlaneseq (!%p157_p3) }
   0x9   : > { %s1954_s18 = smov (%p28_p4, %s1952_s18), 0  ;;  %160 = sbr.rel (%p157_p3) target bundleno = 309 (0x135), region = 28 }
   0xa   : > { %v1413_v1 = vld [vmem:[%s1897_s1] sm:$0xff] (!%p157_p3)   ;;  %1290 = vmatprep.subr.bf16.mxu1 (!%p157_p3), %v1412_v0  ;;  %v1415_v3 = vld [vmem:[%s1897_s1 + $0x8] sm:$0xff] (!%p157_p3)   ;;  %s253_s30 = sadd.s32 (!%p157_p3), 16, %s1544_s23  ;;  %v1417_v5 = vld [vmem:[%s1897_s1 + $0x10] sm:$0xff] (!%p157_p3)   ;;  %s217_s10 = sshra.s32 (!%p157_p3), %s1544_s23, 3  ;;  %v1616_v33 = vshrl.u32 (!%p157_p3), %v757_v32, 7  ;;  %v1620_v35 = vstv (!%p157_p3), %s1544_s23 }
   0xb   : > { %1322 = vmatprep.subr.bf16.mxu0 (!%p157_p3), %v1413_v1  ;;  %1291 = vmatpush3.bf16.msra.mxu1 (!%p157_p3), %v1412_v0  ;;  %s254_s7 = sshra.s32 (!%p157_p3), %s253_s30, 3  ;;  %v1418_v6 = vld [vmem:[%s1897_s1 + $0x58] sm:$0xff] (!%p157_p3)   ;;  %s1111_s25 = sshll.u32 (!%p157_p3), %s217_s10, 2  ;;  %v1420_v8 = vld [vmem:[%s1897_s1 + $0x60] sm:$0xff] (!%p157_p3)   ;;  %v1422_v10 = vld [vmem:[%s1897_s1 + $0x68] sm:$0xff] (!%p157_p3)  }
   0xc   : > { %1323 = vmatpush3.bf16.msra.mxu0 (!%p157_p3), %v1413_v1  ;;  %1292 = vmatprep.subr.bf16.mxu1 (!%p157_p3), %v1414_v2  ;;  %v1419_v7 = vld [vmem:[%s1897_s1 + $0x18] sm:$0xff] (!%p157_p3)   ;;  %s1112_s24 = sshll.u32 (!%p157_p3), %s254_s7, 2  ;;  %v1421_v9 = vld [vmem:[%s1897_s1 + $0x20] sm:$0xff] (!%p157_p3)   ;;  %v1423_v11 = vld [vmem:[%s1897_s1 + $0x28] sm:$0xff] (!%p157_p3)   ;;  %v760_v34 = vadd.s32 (!%p157_p3), 16, %v1616_v33  ;;  %v761_v36 = vadd.s32 (!%p157_p3), 24, %v1616_v33  ;;  %v775_v40 = vadd.s32 (!%p157_p3), %v1620_v35, %v1616_v33 }
   0xd   : > { %1324 = vmatprep.subr.bf16.mxu0 (!%p157_p3), %v1415_v3  ;;  %v1424_v14 = vld [vmem:[%s1897_s1 + $0x70] sm:$0xff] (!%p157_p3)   ;;  %v1426_v16 = vld [vmem:[%s1897_s1 + $0x78] sm:$0xff] (!%p157_p3)   ;;  %v759_v37 = vadd.s32 (!%p157_p3), 8, %v1616_v33  ;;  %v764_v39 = vadd.s32 (!%p157_p3), 48, %v1616_v33  ;;  %v762_v42 = vadd.s32 (!%p157_p3), 32, %v1616_v33  ;;  %v765_v43 = vadd.s32 (!%p157_p3), 56, %v1616_v33 }
   0xe   : > { %v1425_v15 = vld [vmem:[%s1897_s1 + $0x30] sm:$0xff] (!%p157_p3)   ;;  %v1427_v17 = vld [vmem:[%s1897_s1 + $0x38] sm:$0xff] (!%p157_p3)   ;;  %v777_v38 = vadd.s32 (!%p157_p3), %v1620_v35, %v760_v34  ;;  %v778_v41 = vadd.s32 (!%p157_p3), %v1620_v35, %v761_v36  ;;  %v763_v45 = vadd.s32 (!%p157_p3), 40, %v1616_v33  ;;  %v791_v48 = vand.u32 (!%p157_p3), 15, %v775_v40  ;;  %s1105_s23 = sshll.u32 (!%p157_p3), %s1466_s12, 4  ;;  %p209_p7 = scmp.lt.s32.totalorder (!%p157_p3), %s1466_s12, 1 }
   0xf   : > { %1293 = vmatpush3.bf16.msra.mxu1 (!%p157_p3), %v1414_v2  ;;  %v776_v44 = vadd.s32 (!%p157_p3), %v1620_v35, %v759_v37  ;;  %v781_v47 = vadd.s32 (!%p157_p3), %v1620_v35, %v764_v39  ;;  %v779_v50 = vadd.s32 (!%p157_p3), %v1620_v35, %v762_v42  ;;  %v782_v51 = vadd.s32 (!%p157_p3), %v1620_v35, %v765_v43  ;;  %p1639_p6 = scmp.lt.s32.totalorder (!%p157_p3), %s1105_s23, 31 }
  0x10   : > { %s1956_s13 = smov (!%p192_p5, %s1470_s13), 1  ;;  %1325 = vmatpush3.bf16.msra.mxu0 %v1415_v3  ;;  %1294 = vmatprep.subr.bf16.mxu1 %v1416_v4  ;;  %v793_v46 = vand.u32 15, %v777_v38  ;;  %v794_v49 = vand.u32 15, %v778_v41  ;;  %v768_v52 = vadd.s32 80, %v1616_v33  ;;  %v780_v54 = vadd.s32 %v1620_v35, %v763_v45  ;;  %s1960_s12 = smov (!%p209_p7, %s1466_s12), 1 }
  0x11   : > { %s1370_s6 = smul.u32 136, %s1956_s13  ;;  %1326 = vmatprep.subr.bf16.mxu0 %v1417_v5  ;;  %v792_v53 = vand.u32 15, %v776_v44  ;;  %vm825_vm1 = vcmp.lt.s32.totalorder %v777_v38, 256  ;;  %v797_v55 = vand.u32 15, %v781_v47  ;;  %vm807_vm2 = vcmp.lt.s32.totalorder %v791_v48, 16  ;;  %s1958_s23 = smov (!%p1639_p6, %s1105_s23), 31 }
  0x12   : > { %vm809_vm0 = vcmp.lt.s32.totalorder %v793_v46, 16  ;;  %vm823_vm3 = vcmp.lt.s32.totalorder %v775_v40, 256  ;;  %vm810_vm4 = vcmp.lt.s32.totalorder %v794_v49, 16  ;;  %v795_v56 = vand.u32 15, %v779_v50  ;;  %s1106_s26 = sshll.u32 %s1956_s13, 5  ;;  %s1108_s5 = sshll.u32 %s1956_s13, 1 }
  0x13   : > { %s196_s22 = scalar_lea.vmem %s1896_s0, %s1370_s6  ;;  %1295 = vmatpush3.bf16.msra.mxu1 %v1416_v4  ;;  %vm826_vm5 = vcmp.lt.s32.totalorder %v778_v41, 256  ;;  %v798_v57 = vand.u32 15, %v782_v51  ;;  %v785_v58 = vadd.s32 %v1620_v35, %v768_v52  ;;  %v766_v59 = vadd.s32 64, %v1616_v33  ;;  %vm1645_vm6 = vmand %vm809_vm0, %vm825_vm1  ;;  %s1679_s27 = sadd.s32 %s1106_s26, %s1958_s23 }
  0x14   : > { %1327 = vmatpush3.bf16.msra.mxu0 %v1417_v5  ;;  %1296 = vmatprep.subr.bf16.mxu1 %v1418_v6  ;;  %s1578_s30 = scalar_lea.vmem %s196_s22, %s1112_s24  ;;  %s1583_s6 = scalar_lea.vmem %s196_s22, %s1111_s25  ;;  %vm808_vm7 = vcmp.lt.s32.totalorder %v792_v53, 16  ;;  %vm824_vm8 = vcmp.lt.s32.totalorder %v776_v44, 256  ;;  %v796_v61 = vand.u32 15, %v780_v54  ;;  %vm1649_vm9 = vmand %vm807_vm2, %vm823_vm3  ;;  %vm813_vm10 = vcmp.lt.s32.totalorder %v797_v55, 16 }
  0x15   : > { %1328 = vmatprep.subr.bf16.mxu0 %v1419_v7  ;;  %v1428_v12 = vld [vmem:[%s1578_s30] sm:$0xff]   ;;  %v1430_v18 = vld [vmem:[%s1578_s30 + $0x8] sm:$0xff]   ;;  %v1432_v20 = vld [vmem:[%s1578_s30 + $0x10] sm:$0xff]   ;;  %vm829_vm11 = vcmp.lt.s32.totalorder %v781_v47, 256  ;;  %vm811_vm13 = vcmp.lt.s32.totalorder %v795_v56, 16  ;;  %vm827_vm14 = vcmp.lt.s32.totalorder %v779_v50, 256  ;;  %v783_v2 = vadd.s32 %v1620_v35, %v766_v59 }
  0x16   : > { %v1429_v13 = vld [vmem:[%s1583_s6] sm:$0xff]   ;;  %1306 = vmatprep.mubr.bf16.mxu1 %v1428_v12  ;;  %v1431_v19 = vld [vmem:[%s1583_s6 + $0x8] sm:$0xff]   ;;  %v1433_v21 = vld [vmem:[%s1583_s6 + $0x10] sm:$0xff]   ;;  %vm814_vm0 = vcmp.lt.s32.totalorder %v798_v57, 16  ;;  %vm830_vm1 = vcmp.lt.s32.totalorder %v782_v51, 256  ;;  %v801_v1 = vand.u32 15, %v785_v58 }
  0x17   : > { %1297 = vmatpush3.bf16.msra.mxu1 %v1418_v6  ;;  %1338 = vmatprep.mubr.bf16.mxu0 %v1429_v13  ;;  %v1434_v22 = vld [vmem:[%s1578_s30 + $0x18] sm:$0xff]   ;;  %v1436_v24 = vld [vmem:[%s1578_s30 + $0x20] sm:$0xff]   ;;  %v1438_v26 = vld [vmem:[%s1578_s30 + $0x28] sm:$0xff]   ;;  %vm812_vm3 = vcmp.lt.s32.totalorder %v796_v61, 16  ;;  %v769_v4 = vadd.s32 88, %v1616_v33  ;;  %v767_v6 = vadd.s32 72, %v1616_v33 }
  0x18   : > { %1329 = vmatpush3.bf16.msra.mxu0 %v1419_v7  ;;  %1298 = vmatprep.subr.bf16.mxu1 %v1420_v8  ;;  %v1435_v23 = vld [vmem:[%s1583_s6 + $0x18] sm:$0xff]   ;;  %v1437_v25 = vld [vmem:[%s1583_s6 + $0x20] sm:$0xff]   ;;  %v1439_v27 = vld [vmem:[%s1583_s6 + $0x28] sm:$0xff]   ;;  %v1484_v12 = vmov 0.0   ;;  %s1107_s28 = sshll.u32 %s1679_s27, 2  ;;  %v772_v32 = vadd.s32 112, %v1616_v33 }
  0x19   : > { %1330 = vmatprep.subr.bf16.mxu0 %v1421_v9  ;;  %v1440_v28 = vld [vmem:[%s1578_s30 + $0x30] sm:$0xff]   ;;  %v1442_v30 = vld [vmem:[%s1578_s30 + $0x38] sm:$0xff]   ;;  %vm1653_vm12 = vmand %vm810_vm4, %vm826_vm5  ;;  %vm828_vm4 = vcmp.lt.s32.totalorder %v780_v54, 256  ;;  %v1179_v13 = vsel %vm1645_vm6, 1.0, %v1484_v12  ;;  %v770_v39 = vadd.s32 96, %v1616_v33  ;;  %s1737_s4 = scalar_lea.vmem %s1898_s2, %s1107_s28  ;;  %v773_v48 = vadd.s32 120, %v1616_v33 }
  0x1a   : > { %v1441_v29 = vld [vmem:[%s1583_s6 + $0x30] sm:$0xff]   ;;  %v1443_v31 = vld [vmem:[%s1583_s6 + $0x38] sm:$0xff]   ;;  %vm1659_vm15 = vmand %vm808_vm7, %vm824_vm8  ;;  %v1752_v52 = vadd.s32 %v1620_v35, %v772_v32  ;;  %v771_v57 = vadd.s32 104, %v1616_v33  ;;  %s212_s6 = sadd.s32 %s1108_s5, %s1960_s12 }
  0x1b   : > { %1299 = vmatpush3.bf16.msra.mxu1 %v1420_v8  ;;  %vm1665_vm2 = vmand %vm813_vm10, %vm829_vm11  ;;  %vm1685_vm10 = vcmp.lt.s32.totalorder %v801_v1, 16  ;;  %vm833_vm11 = vcmp.lt.s32.totalorder %v785_v58, 256  ;;  %v1760_v56 = vadd.s32 %v1620_v35, %v770_v39  ;;  %v1776_v33 = vadd.s32 %v1620_v35, %v773_v48  ;;  %s1109_s7 = sshll.u32 %s212_s6, 1 }
  0x1c   : > { %1331 = vmatpush3.bf16.msra.mxu0 %v1421_v9  ;;  %1300 = vmatprep.subr.bf16.mxu1 %v1422_v10  ;;  %vm1670_vm5 = vmand %vm811_vm13, %vm827_vm14  ;;  %v805_v8 = vand.u32 15, %v1752_v52  ;;  %s214_s10 = scalar_lea.vmem %s1899_s3, %s1109_s7 }
  0x1d   : > { %1332 = vmatprep.subr.bf16.mxu0 %v1423_v11  ;;  %vm1675_vm7 = vmand %vm814_vm0, %vm830_vm1 }
  0x1e   : > { %vm1681_vm8 = vmand %vm812_vm3, %vm828_vm4  ;;  %vm1804_vm4 = vcmp.lt.s32.totalorder %v805_v8, 16 }
  0x1f   : > { %1301 = vmatpush3.bf16.msra.mxu1 %v1422_v10  ;;  %v799_v10 = vand.u32 15, %v783_v2  ;;  %vm849_vm6 = vmand %vm1685_vm10, %vm833_vm11  ;;  %vm838_vm11 = vcmp.lt.s32.totalorder %v1776_v33, 256 }
  0x20   : > { %1333 = vmatpush3.bf16.msra.mxu0 %v1423_v11  ;;  %1302 = vmatprep.subr.bf16.mxu1 %v1424_v14  ;;  %v1740_v42 = vsel %vm849_vm6, 1.0, %v1484_v12 }
  0x21   : > { %1334 = vmatprep.subr.bf16.mxu0 %v1425_v15 }
  0x23   : > { %1303 = vmatpush3.bf16.msra.mxu1 %v1424_v14  ;;  %v1177_v14 = vsel %vm1649_vm9, 1.0, %v1484_v12  ;;  %vm1727_vm9 = vcmp.lt.s32.totalorder %v799_v10, 16 }
  0x24   : > { %1335 = vmatpush3.bf16.msra.mxu0 %v1425_v15  ;;  %1304 = vmatprep.subr.bf16.mxu1 %v1426_v16  ;;  %v1696_v15 = vadd.s32 %v1620_v35, %v769_v4 }
  0x25   : > { %1336 = vmatprep.subr.bf16.mxu0 %v1427_v17 }
  0x26   : > { %v802_v38 = vand.u32 15, %v1696_v15 }
  0x27   : > { %1305 = vmatpush3.bf16.msra.mxu1 %v1426_v16 }
  0x28   : > { %1337 = vmatpush3.bf16.msra.mxu0 %v1427_v17  ;;  %vm1755_vm14 = vcmp.lt.s32.totalorder %v802_v38, 16 }
  0x2a   : > { %1307 = vmatmul.mubr.bf16.vlgmr.msra.gmra.mrb[0].mxu1 %v1430_v18  ;;  %v1180_v18 = vsel %vm1653_vm12, 1.0, %v1484_v12  ;;  %vm831_vm12 = vcmp.lt.s32.totalorder %v783_v2, 256 }
  0x2b   : > { %1339 = vmatmul.mubr.bf16.vlgmr.msra.gmra.mrb[0].mxu0 %v1431_v19  ;;  %1310 = vmatprep.mubr.bf16.mxu1 %v1432_v20  ;;  %v1178_v19 = vsel %vm1659_vm15, 1.0, %v1484_v12  ;;  %v1183_v20 = vsel %vm1665_vm2, 1.0, %v1484_v12  ;;  %vm1746_vm13 = vmand %vm1727_vm9, %vm831_vm12  ;;  %vm834_vm15 = vcmp.lt.s32.totalorder %v1696_v15, 256 }
  0x2c   : > { %1342 = vmatprep.mubr.bf16.mxu0 %v1433_v21  ;;  %v1708_v21 = vadd.s32 %v1620_v35, %v767_v6  ;;  %v1767_v62 = vsel %vm1746_vm13, 1.0, %v1484_v12  ;;  %vm1783_vm2 = vmand %vm1755_vm14, %vm834_vm15 }
  0x2e   : > { %v800_v43 = vand.u32 15, %v1708_v21  ;;  %vm832_vm1 = vcmp.lt.s32.totalorder %v1708_v21, 256  ;;  %v1188_v21 = vsel %vm1783_vm2, 1.0, %v1484_v12 }
  0x30   : > { %vm1770_vm0 = vcmp.lt.s32.totalorder %v800_v43, 16 }
  0x31   : > { %vm848_vm3 = vmand %vm1770_vm0, %vm832_vm1  ;;  %vm961_vm0 = vcmask 1040384  }
  0x32   : > { %1311 = vmatmul.mubr.bf16.gmra.mrb[4].mxu1 %v1434_v22 }
  0x33   : > { %1343 = vmatmul.mubr.bf16.gmra.mrb[4].mxu0 %v1435_v23  ;;  %1314 = vmatprep.mubr.bf16.mxu1 %v1436_v24 }
  0x34   : > { %1346 = vmatprep.mubr.bf16.mxu0 %v1437_v25  ;;  %v1181_v25 = vsel %vm1670_vm5, 1.0, %v1484_v12  ;;  %vm837_vm5 = vcmp.lt.s32.totalorder %v1752_v52, 256 }
  0x35   : > { %vm1826_vm6 = vmand %vm1804_vm4, %vm837_vm5 }
  0x3a   : > { %1315 = vmatmul.mubr.bf16.gmra.mrb[8].mxu1 %v1438_v26  ;;  %v1717_v26 = vsel %vm1675_vm7, 1.0, %v1484_v12 }
  0x3b   : > { %1347 = vmatmul.mubr.bf16.gmra.mrb[8].mxu0 %v1439_v27  ;;  %1318 = vmatprep.mubr.bf16.mxu1 %v1440_v28  ;;  %v1722_v27 = vsel %vm1681_vm8, 1.0, %v1484_v12  ;;  %vm835_vm8 = vcmp.lt.s32.totalorder %v1760_v56, 256 }
  0x3c   : > { %1350 = vmatprep.mubr.bf16.mxu0 %v1441_v29 }
  0x42   : > { %1319 = vmatmul.mubr.bf16.gmra.mrb[12].mxu1 %v1442_v30 }
  0x43   : > { %1351 = vmatmul.mubr.bf16.gmra.mrb[12].mxu0 %v1443_v31 }
  0xfd   : > { %v1308_v11 = vpop.f32.mrb[0].mxu1 }
  0xfe   : > { %v1340_v16 = vpop.f32.mrb[0].mxu0  ;;  %v421_v17 = vpop.f32.mrb[1].mxu1 }
  0xff   : > { %v623_v22 = vadd.f32 %v1340_v16, %v1308_v11  ;;  %v614_v23 = vpop.f32.mrb[1].mxu0  ;;  %v1309_v24 = vpop.f32.mrb[2].mxu1  ;;  %v1789_v16 = vadd.s32 %v1620_v35, %v771_v57 }
 0x100   : > { %v615_v28 = vadd.f32 %v614_v23, %v421_v17  ;;  %v1341_v29 = vpop.f32.mrb[2].mxu0  ;;  %v424_v30 = vpop.f32.mrb[3].mxu1 }
 0x101   : > { %v889_v34 = vmul.f32 %v1179_v13, %v623_v22  ;;  %v626_v36 = vadd.f32 %v1341_v29, %v1309_v24  ;;  %v617_v37 = vpop.f32.mrb[3].mxu0  ;;  %v806_v24 = vand.u32 15, %v1776_v33  ;;  %v804_v39 = vand.u32 15, %v1789_v16 }
 0x102   : > { %v887_v40 = vmul.f32 %v1177_v14, %v615_v28  ;;  %v618_v41 = vadd.f32 %v617_v37, %v424_v30  ;;  %v803_v14 = vand.u32 15, %v1760_v56  ;;  %vm836_vm12 = vcmp.lt.s32.totalorder %v1789_v16, 256 }
 0x103   : > { %v926_v44 = vmul.f32 %v889_v34, %v623_v22  ;;  %v1219_v45 = vpack.c.bf16 %v626_v36, %v623_v22  ;;  %v890_v46 = vmul.f32 %v1180_v18, %v626_v36  ;;  %vm1815_vm10 = vcmp.lt.s32.totalorder %v806_v24, 16 }
 0x104   : > { %v924_v49 = vmul.f32 %v887_v40, %v615_v28  ;;  %v1214_v50 = vpack.c.bf16 %v618_v41, %v615_v28  ;;  %v888_v51 = vmul.f32 %v1178_v19, %v618_v41  ;;  %vm1810_vm7 = vcmp.lt.s32.totalorder %v803_v14, 16  ;;  %vm1847_vm14 = vmand %vm1815_vm10, %vm838_vm11 }
 0x105   : > { %1251 = vst [vmem:[%s1737_s4 + $0x8] sm:$0xff] %v1219_v45   ;;  %v927_v53 = vmul.f32 %v890_v46, %v626_v36  ;;  %v1312_v54 = vpop.f32.mrb[4].mxu1  ;;  %vm1830_vm9 = vcmp.lt.s32.totalorder %v804_v39, 16  ;;  %vm1839_vm13 = vmand %vm1810_vm7, %vm835_vm8 }
 0x106   : > { %1215 = vst [vmem:[%s1737_s4] sm:$0xff] %v1214_v50   ;;  %v903_v58 = vadd.f32 %v888_v51, %v887_v40  ;;  %v925_v59 = vmul.f32 %v888_v51, %v618_v41  ;;  %v1344_v60 = vpop.f32.mrb[4].mxu0  ;;  %v437_v61 = vpop.f32.mrb[5].mxu1  ;;  %vm1856_vm15 = vmand %vm1830_vm9, %vm836_vm12  ;;  %v1189_v16 = vsel %vm1839_vm13, 1.0, %v1484_v12 }
 0x107   : > { %v639_v63 = vadd.f32 %v1344_v60, %v1312_v54  ;;  %v630_v0 = vpop.f32.mrb[5].mxu0  ;;  %v1313_v1 = vpop.f32.mrb[6].mxu1  ;;  %v1190_v24 = vsel %vm1856_vm15, 1.0, %v1484_v12 }
 0x108   : > { %v904_v3 = vadd.f32 %v903_v58, %v889_v34  ;;  %v940_v4 = vadd.f32 %v925_v59, %v924_v49  ;;  %v631_v5 = vadd.f32 %v630_v0, %v437_v61  ;;  %v1345_v6 = vpop.f32.mrb[6].mxu0  ;;  %v440_v7 = vpop.f32.mrb[7].mxu1  ;;  %v1186_v34 = vsel %vm848_vm3, 1.0, %v1484_v12 }
 0x109   : > { %v893_v9 = vmul.f32 %v1183_v20, %v639_v63  ;;  %v642_v10 = vadd.f32 %v1345_v6, %v1313_v1  ;;  %v633_v11 = vpop.f32.mrb[7].mxu0 }
 0x10a   : > { %v941_v17 = vadd.f32 %v940_v4, %v926_v44  ;;  %v891_v18 = vmul.f32 %v1181_v25, %v631_v5  ;;  %v905_v19 = vadd.f32 %v904_v3, %v890_v46  ;;  %v634_v20 = vadd.f32 %v633_v11, %v440_v7 }
 0x10b   : > { %v930_v15 = vmul.f32 %v893_v9, %v639_v63  ;;  %v1229_v22 = vpack.c.bf16 %v642_v10, %v639_v63  ;;  %v894_v23 = vmul.f32 %v1717_v26, %v642_v10 }
 0x10c   : > { %v906_v28 = vadd.f32 %v905_v19, %v891_v18  ;;  %v928_v29 = vmul.f32 %v891_v18, %v631_v5  ;;  %v942_v35 = vadd.f32 %v941_v17, %v927_v53  ;;  %v1224_v30 = vpack.c.bf16 %v634_v20, %v631_v5 }
 0x10d   : > { %1253 = vst [vmem:[%s1737_s4 + $0x18] sm:$0xff] %v1229_v22   ;;  %v931_v25 = vmul.f32 %v894_v23, %v642_v10  ;;  %v892_v31 = vmul.f32 %v1722_v27, %v634_v20  ;;  %v1316_v32 = vpop.f32.mrb[8].mxu1  ;;  %v1191_v10 = vsel %vm1826_vm6, 1.0, %v1484_v12  ;;  %v1192_v22 = vsel %vm1847_vm14, 1.0, %v1484_v12 }
 0x10e   : > { %v943_v36 = vadd.f32 %v942_v35, %v928_v29  ;;  %1252 = vst [vmem:[%s1737_s4 + $0x10] sm:$0xff] %v1224_v30   ;;  %v1348_v26 = vpop.f32.mrb[8].mxu0  ;;  %v453_v37 = vpop.f32.mrb[9].mxu1 }
 0x10f   : > { %v907_v27 = vadd.f32 %v906_v28, %v892_v31  ;;  %v929_v40 = vmul.f32 %v892_v31, %v634_v20  ;;  %v655_v41 = vadd.f32 %v1348_v26, %v1316_v32  ;;  %v646_v43 = vpop.f32.mrb[9].mxu0  ;;  %v1317_v44 = vpop.f32.mrb[10].mxu1 }
 0x110   : > { %v647_v46 = vadd.f32 %v646_v43, %v453_v37  ;;  %v1349_v47 = vpop.f32.mrb[10].mxu0  ;;  %v456_v48 = vpop.f32.mrb[11].mxu1 }
 0x111   : > { %v908_v50 = vadd.f32 %v907_v27, %v893_v9  ;;  %v944_v51 = vadd.f32 %v943_v36, %v929_v40  ;;  %v897_v53 = vmul.f32 %v1740_v42, %v655_v41  ;;  %v658_v54 = vadd.f32 %v1349_v47, %v1317_v44  ;;  %v649_v55 = vpop.f32.mrb[11].mxu0 }
 0x112   : > { %v895_v57 = vmul.f32 %v1767_v62, %v647_v46  ;;  %v650_v58 = vadd.f32 %v649_v55, %v456_v48 }
 0x113   : > { %v945_v42 = vadd.f32 %v944_v51, %v930_v15  ;;  %v934_v61 = vmul.f32 %v897_v53, %v655_v41  ;;  %v909_v62 = vadd.f32 %v908_v50, %v894_v23  ;;  %v1239_v63 = vpack.c.bf16 %v658_v54, %v655_v41 }
 0x114   : > { %v932_v0 = vmul.f32 %v895_v57, %v647_v46  ;;  %v898_v1 = vmul.f32 %v1188_v21, %v658_v54  ;;  %v1234_v2 = vpack.c.bf16 %v650_v58, %v647_v46  ;;  %v896_v3 = vmul.f32 %v1186_v34, %v650_v58 }
 0x115   : > { %v910_v5 = vadd.f32 %v909_v62, %v895_v57  ;;  %v946_v56 = vadd.f32 %v945_v42, %v931_v25  ;;  %1255 = vst [vmem:[%s1737_s4 + $0x28] sm:$0xff] %v1239_v63   ;;  %v1320_v6 = vpop.f32.mrb[12].mxu1 }
 0x116   : > { %v935_v8 = vmul.f32 %v898_v1, %v658_v54  ;;  %1254 = vst [vmem:[%s1737_s4 + $0x20] sm:$0xff] %v1234_v2   ;;  %v933_v33 = vmul.f32 %v896_v3, %v650_v58  ;;  %v1352_v9 = vpop.f32.mrb[12].mxu0  ;;  %v469_v11 = vpop.f32.mrb[13].mxu1 }
 0x117   : > { %v947_v13 = vadd.f32 %v946_v56, %v932_v0  ;;  %v911_v14 = vadd.f32 %v910_v5, %v896_v3  ;;  %v671_v17 = vadd.f32 %v1352_v9, %v1320_v6  ;;  %v662_v18 = vpop.f32.mrb[13].mxu0  ;;  %v1321_v19 = vpop.f32.mrb[14].mxu1 }
 0x118   : > { %v663_v20 = vadd.f32 %v662_v18, %v469_v11  ;;  %v1353_v15 = vpop.f32.mrb[14].mxu0  ;;  %v472_v23 = vpop.f32.mrb[15].mxu1 }
 0x119   : > { %v912_v28 = vadd.f32 %v911_v14, %v897_v53  ;;  %v948_v29 = vadd.f32 %v947_v13, %v933_v33  ;;  %v901_v35 = vmul.f32 %v1191_v10, %v671_v17  ;;  %v674_v30 = vadd.f32 %v1353_v15, %v1321_v19  ;;  %v665_v25 = vpop.f32.mrb[15].mxu0 }
 0x11a   : > { %v899_v31 = vmul.f32 %v1189_v16, %v663_v20  ;;  %v666_v32 = vadd.f32 %v665_v25, %v472_v23 }
 0x11b   : > { %v949_v21 = vadd.f32 %v948_v29, %v934_v61  ;;  %v938_v34 = vmul.f32 %v901_v35, %v671_v17  ;;  %v913_v36 = vadd.f32 %v912_v28, %v898_v1  ;;  %v1249_v26 = vpack.c.bf16 %v674_v30, %v671_v17 }
 0x11c   : > { %v936_v37 = vmul.f32 %v899_v31, %v663_v20  ;;  %v902_v38 = vmul.f32 %v1192_v22, %v674_v30  ;;  %v1244_v39 = vpack.c.bf16 %v666_v32, %v663_v20  ;;  %v900_v27 = vmul.f32 %v1190_v24, %v666_v32 }
 0x11d   : > { %v914_v12 = vadd.f32 %v913_v36, %v899_v31  ;;  %v950_v40 = vadd.f32 %v949_v21, %v935_v8  ;;  %1257 = vst [vmem:[%s1737_s4 + $0x38] sm:$0xff] %v1249_v26  }
 0x11e   : > { %v939_v41 = vmul.f32 %v902_v38, %v674_v30  ;;  %1256 = vst [vmem:[%s1737_s4 + $0x30] sm:$0xff] %v1244_v39   ;;  %v937_v43 = vmul.f32 %v900_v27, %v666_v32 }
 0x11f   : > { %v951_v44 = vadd.f32 %v950_v40, %v936_v37  ;;  %v915_v45 = vadd.f32 %v914_v12, %v900_v27 }
 0x121   : > { %v916_v46 = vadd.f32 %v915_v45, %v901_v35  ;;  %v952_v47 = vadd.f32 %v951_v44, %v937_v43 }
 0x123   : > { %v917_v48 = vadd.f32 %v916_v46, %v902_v38  ;;  %v953_v49 = vadd.f32 %v952_v47, %v938_v34 }
 0x125   : > { %v918_v50 = vrot.slane %v917_v48, 4  ;;  %v954_v51 = vadd.f32 %v953_v49, %v939_v41 }
 0x127   : > { %v919_v53 = vadd.f32 %v918_v50, %v917_v48  ;;  %v955_v54 = vrot.slane %v954_v51, 4 }
 0x129   : > { %v920_v55 = vrot.slane %v919_v53, 2  ;;  %v956_v57 = vadd.f32 %v955_v54, %v954_v51 }
 0x12b   : > { %v921_v58 = vadd.f32 %v920_v55, %v919_v53  ;;  %v957_v59 = vrot.slane %v956_v57, 2 }
 0x12d   : > { %v922_v60 = vrot.slane %v921_v58, 1  ;;  %v958_v42 = vadd.f32 %v957_v59, %v956_v57 }
 0x12f   : > { %v959_v61 = vrot.slane %v958_v42, 1  ;;  %v923_v62 = vadd.f32 %v922_v60, %v921_v58 }
 0x131   : > { %v960_v63 = vadd.f32 %v959_v61, %v958_v42 }
 0x133   : > { %v962_v52 = vsel %vm961_vm0, %v923_v62, %v960_v63 }
 0x134   : > { %963 = vst [vmem:[%s214_s10] sm:$0x3] %v962_v52 }
 0x135 PF: > { %s14_s16 = sadd.s32 1, %s1482_s16   ;;  %s1945_s12 = smov %s1474_s14 }
 0x136   : > { %p11_p8 = scmp.ge.s32.totalorder %s14_s16, 6   ;;  %s1946_s13 = smov %s1478_s15 }
 0x137   : > { %s1947_s14 = smov %s1950_s17  ;;  %s1948_s15 = smov %s1954_s18 }
 0x138   :  { %13 = sbr.rel (!%p11_p8) target bundleno = 3 (0x3), region = 73 }

// kernel: discriminator_forward.7
= control target key start
LH: loop header
LB: loop body
LE: loop exit
PB: predicated region body
PF: predicated region fallthrough
CT: control target
= control target key end

     0   :  { %s1322_s12 = smov 0   ;;  %s1324_s13 = smov 0   ;;  %s1480_s0 = inlined_call_operand.vmem [shape: bf16[2,72,256], index: 0, kind: input, shape index: {}]   ;;  %s1481_s1 = inlined_call_operand.vmem [shape: bf16[2,256,128], index: 1, kind: input, shape index: {}]   ;;  %s1482_s2 = inlined_call_operand.vmem [shape: bf16[2,64,128], index: 2, kind: output, shape index: {0}]   ;;  %s1483_s3 = inlined_call_operand.vmem [shape: f32[2,1,2,128], index: 3, kind: output, shape index: {1}]  }
   0x1   :  { %s1326_s14 = smov 0  }
   0x2 LB: > { %s26_s15 = sadd.s32 1, %s1296_s13  ;;  %p990_p0 = scmp.ge.s32.totalorder %s1300_s14, 1  ;;  %s1300_s14 = sphi %s1326_s14, %s14_s14   ;;  %s1296_s13 = sphi %s1324_s13, %s1485_s13   ;;  %s1292_s12 = sphi %s1322_s12, %s1484_s12  }
   0x3   : > { %p28_p1 = scmp.ge.s32.totalorder %s26_s15, 2  ;;  %p156_p2 = scmp.lt.s32.totalorder %s1300_s14, 3 }
   0x5   : > { %s1487_s15 = smov (%p28_p1, %s26_s15), 0  ;;  %p157_p3 = pnand %p990_p0, %p156_p2 }
   0x6   : > { %v1230_v0 = vld [vmem:[%s1481_s1 + $0xc0] sm:$0xff] (!%p157_p3)   ;;  %v1234_v4 = vld [vmem:[%s1481_s1 + $0xc8] sm:$0xff] (!%p157_p3)   ;;  %v1238_v8 = vld [vmem:[%s1481_s1 + $0xd0] sm:$0xff] (!%p157_p3)   ;;  %p191_p4 = scmp.lt.s32.totalorder (!%p157_p3), %s1292_s12, 1  ;;  %vm857_vm0 = vcmask (!%p157_p3), 1040384  }
   0x7   : > { %160 = sbr.rel (%p157_p3) target bundleno = 302 (0x12e), region = 28  ;;  %v1231_v1 = vld [vmem:[%s1481_s1 + $0x40] sm:$0xff] (!%p157_p3)   ;;  %1125 = vmatprep.subr.bf16.mxu0 (!%p157_p3), %v1230_v0  ;;  %v1235_v5 = vld [vmem:[%s1481_s1 + $0x48] sm:$0xff] (!%p157_p3)   ;;  %v1239_v9 = vld [vmem:[%s1481_s1 + $0x50] sm:$0xff] (!%p157_p3)  }
   0x8   : > { %v1232_v2 = vld [vmem:[%s1481_s1 + $0x80] sm:$0xff] (!%p157_p3)   ;;  %1165 = vmatprep.subr.bf16.mxu1 (!%p157_p3), %v1231_v1  ;;  %v1236_v6 = vld [vmem:[%s1481_s1 + $0x88] sm:$0xff] (!%p157_p3)   ;;  %v1240_v10 = vld [vmem:[%s1481_s1 + $0x90] sm:$0xff] (!%p157_p3)  }
   0x9   : > { %v1233_v3 = vld [vmem:[%s1481_s1] sm:$0xff] (!%p157_p3)   ;;  %1126 = vmatpush3.bf16.msra.mxu0 (!%p157_p3), %v1232_v2  ;;  %v1237_v7 = vld [vmem:[%s1481_s1 + $0x8] sm:$0xff] (!%p157_p3)   ;;  %v1241_v11 = vld [vmem:[%s1481_s1 + $0x10] sm:$0xff] (!%p157_p3)  }
   0xa   : > { %1166 = vmatpush3.bf16.msra.mxu1 (!%p157_p3), %v1233_v3  ;;  %1127 = vmatprep.subr.bf16.mxu0 (!%p157_p3), %v1234_v4  ;;  %v1242_v12 = vld [vmem:[%s1481_s1 + $0xd8] sm:$0xff] (!%p157_p3)   ;;  %v1246_v16 = vld [vmem:[%s1481_s1 + $0xe0] sm:$0xff] (!%p157_p3)   ;;  %v1250_v20 = vld [vmem:[%s1481_s1 + $0xe8] sm:$0xff] (!%p157_p3)  }
   0xb   : > { %1167 = vmatprep.subr.bf16.mxu1 (!%p157_p3), %v1235_v5  ;;  %v1243_v13 = vld [vmem:[%s1481_s1 + $0x58] sm:$0xff] (!%p157_p3)   ;;  %v1247_v17 = vld [vmem:[%s1481_s1 + $0x60] sm:$0xff] (!%p157_p3)   ;;  %v1251_v21 = vld [vmem:[%s1481_s1 + $0x68] sm:$0xff] (!%p157_p3)  }
   0xc   : > { %v1244_v14 = vld [vmem:[%s1481_s1 + $0x98] sm:$0xff] (!%p157_p3)   ;;  %v1248_v18 = vld [vmem:[%s1481_s1 + $0xa0] sm:$0xff] (!%p157_p3)   ;;  %v1252_v22 = vld [vmem:[%s1481_s1 + $0xa8] sm:$0xff] (!%p157_p3)  }
   0xd   : > { %1128 = vmatpush3.bf16.msra.mxu0 (!%p157_p3), %v1236_v6  ;;  %v1245_v15 = vld [vmem:[%s1481_s1 + $0x18] sm:$0xff] (!%p157_p3)   ;;  %v1249_v19 = vld [vmem:[%s1481_s1 + $0x20] sm:$0xff] (!%p157_p3)   ;;  %v1253_v23 = vld [vmem:[%s1481_s1 + $0x28] sm:$0xff] (!%p157_p3)  }
   0xe   : > { %1168 = vmatpush3.bf16.msra.mxu1 %v1237_v7  ;;  %1129 = vmatprep.subr.bf16.mxu0 %v1238_v8  ;;  %s1489_s12 = smov (!%p191_p4, %s1292_s12), 1  ;;  %v1254_v24 = vld [vmem:[%s1481_s1 + $0xf0] sm:$0xff]   ;;  %v1258_v28 = vld [vmem:[%s1481_s1 + $0xf8] sm:$0xff]  }
   0xf   : > { %1169 = vmatprep.subr.bf16.mxu1 %v1239_v9  ;;  %v1255_v25 = vld [vmem:[%s1481_s1 + $0x70] sm:$0xff]   ;;  %s1205_s22 = smul.u32 72, %s1489_s12  ;;  %v1259_v29 = vld [vmem:[%s1481_s1 + $0x78] sm:$0xff]   ;;  %s1093_s11 = sshll.u32 %s1489_s12, 5 }
  0x10   : > { %v1256_v26 = vld [vmem:[%s1481_s1 + $0xb0] sm:$0xff]   ;;  %v1260_v30 = vld [vmem:[%s1481_s1 + $0xb8] sm:$0xff]   ;;  %s1461_s18 = scalar_lea.vmem %s1482_s2, %s1093_s11  ;;  %s994_s19 = sshll.u32 %s1489_s12, 1 }
  0x11   : > { %1130 = vmatpush3.bf16.msra.mxu0 %v1240_v10  ;;  %v1257_v27 = vld [vmem:[%s1481_s1 + $0x30] sm:$0xff]   ;;  %s1440_s6 = scalar_lea.vmem %s1480_s0, %s1205_s22  ;;  %v1261_v31 = vld [vmem:[%s1481_s1 + $0x38] sm:$0xff]   ;;  %s212_s22 = scalar_lea.vmem %s1483_s3, %s994_s19 }
  0x12   : > { %1170 = vmatpush3.bf16.msra.mxu1 %v1241_v11  ;;  %1131 = vmatprep.subr.bf16.mxu0 %v1242_v12  ;;  %v995_v32 = vld [vmem:[%s1440_s6 + $0x8] sm:$0xff]  ;;  %v996_v33 = vld [vmem:[%s1440_s6 + $0x10] sm:$0xff]  ;;  %v220_v34 = vld [vmem:[%s1440_s6] sm:$0xff] }
  0x13   : > { %1171 = vmatprep.subr.bf16.mxu1 %v1243_v13  ;;  %v1035_v35 = vcombine.low %v995_v32, %v996_v33  ;;  %v1036_v36 = vcombine.high %v995_v32, %v996_v33  ;;  %v1059_v37 = vcombine.low %v220_v34, %v995_v32  ;;  %v1060_v38 = vcombine.high %v220_v34, %v995_v32  ;;  %v997_v39 = vld [vmem:[%s1440_s6 + $0x18] sm:$0xff]  ;;  %v998_v40 = vld [vmem:[%s1440_s6 + $0x20] sm:$0xff]  ;;  %v999_v43 = vld [vmem:[%s1440_s6 + $0x28] sm:$0xff] }
  0x14   : > { %v1038_v41 = vcombine.high %v997_v39, %v998_v40  ;;  %v1062_v42 = vcombine.high %v996_v33, %v997_v39  ;;  %v1000_v44 = vld [vmem:[%s1440_s6 + $0x30] sm:$0xff]  ;;  %v1037_v45 = vcombine.low %v997_v39, %v998_v40  ;;  %v1061_v46 = vcombine.low %v996_v33, %v997_v39  ;;  %v1001_v49 = vld [vmem:[%s1440_s6 + $0x38] sm:$0xff]  ;;  %v1002_v50 = vld [vmem:[%s1440_s6 + $0x40] sm:$0xff] }
  0x15   : > { %1132 = vmatpush3.bf16.msra.mxu0 %v1244_v14  ;;  %475 = vmatprep.mubr.bf16.mxu0 %v1036_v36  ;;  %v1040_v47 = vcombine.high %v999_v43, %v1000_v44  ;;  %v1064_v48 = vcombine.high %v998_v40, %v999_v43  ;;  %v1039_v51 = vcombine.low %v999_v43, %v1000_v44 }
  0x16   : > { %1172 = vmatpush3.bf16.msra.mxu1 %v1245_v15  ;;  %1133 = vmatprep.subr.bf16.mxu0 %v1246_v16  ;;  %v1063_v52 = vcombine.low %v998_v40, %v999_v43  ;;  %v1042_v53 = vcombine.high %v1001_v49, %v1002_v50  ;;  %v1066_v54 = vcombine.high %v1000_v44, %v1001_v49 }
  0x17   : > { %1173 = vmatprep.subr.bf16.mxu1 %v1247_v17  ;;  %676 = vmatprep.mubr.bf16.mxu1 %v1060_v38  ;;  %v1041_v55 = vcombine.low %v1001_v49, %v1002_v50  ;;  %v1065_v56 = vcombine.low %v1000_v44, %v1001_v49 }
  0x19   : > { %1134 = vmatpush3.bf16.msra.mxu0 %v1248_v18 }
  0x1a   : > { %1174 = vmatpush3.bf16.msra.mxu1 %v1249_v19  ;;  %1135 = vmatprep.subr.bf16.mxu0 %v1250_v20 }
  0x1b   : > { %1175 = vmatprep.subr.bf16.mxu1 %v1251_v21 }
  0x1d   : > { %1136 = vmatpush3.bf16.msra.mxu0 %v1252_v22 }
  0x1e   : > { %1176 = vmatpush3.bf16.msra.mxu1 %v1253_v23  ;;  %1137 = vmatprep.subr.bf16.mxu0 %v1254_v24 }
  0x1f   : > { %1177 = vmatprep.subr.bf16.mxu1 %v1255_v25 }
  0x21   : > { %1138 = vmatpush3.bf16.msra.mxu0 %v1256_v26 }
  0x22   : > { %1178 = vmatpush3.bf16.msra.mxu1 %v1257_v27  ;;  %1139 = vmatprep.subr.bf16.mxu0 %v1258_v28 }
  0x23   : > { %1179 = vmatprep.subr.bf16.mxu1 %v1259_v29 }
  0x25   : > { %1140 = vmatpush3.bf16.msra.mxu0 %v1260_v30 }
  0x26   : > { %1180 = vmatpush3.bf16.msra.mxu1 %v1261_v31 }
  0x28   : > { %476 = vmatmul.mubr.bf16.vlgmr.msra.gmra.mrb[0].mxu0 %v1035_v35 }
  0x29   : > { %677 = vmatmul.mubr.bf16.vlgmr.msra.gmra.mrb[0].mxu1 %v1059_v37  ;;  %483 = vmatprep.mubr.bf16.mxu0 %v1038_v41 }
  0x2a   : > { %684 = vmatprep.mubr.bf16.mxu1 %v1062_v42 }
  0x30   : > { %484 = vmatmul.mubr.bf16.gmra.mrb[4].mxu0 %v1037_v45 }
  0x31   : > { %685 = vmatmul.mubr.bf16.gmra.mrb[4].mxu1 %v1061_v46  ;;  %491 = vmatprep.mubr.bf16.mxu0 %v1040_v47 }
  0x32   : > { %692 = vmatprep.mubr.bf16.mxu1 %v1064_v48 }
  0x38   : > { %492 = vmatmul.mubr.bf16.gmra.mrb[8].mxu0 %v1039_v51 }
  0x39   : > { %693 = vmatmul.mubr.bf16.gmra.mrb[8].mxu1 %v1063_v52  ;;  %499 = vmatprep.mubr.bf16.mxu0 %v1042_v53 }
  0x3a   : > { %700 = vmatprep.mubr.bf16.mxu1 %v1066_v54 }
  0x40   : > { %500 = vmatmul.mubr.bf16.gmra.mrb[12].mxu0 %v1041_v55 }
  0x41   : > { %701 = vmatmul.mubr.bf16.gmra.mrb[12].mxu1 %v1065_v56 }
  0xfb   : > { %v1141_v57 = vpop.f32.mrb[0].mxu0 }
  0xfc   : > { %v1181_v58 = vpop.f32.mrb[0].mxu1  ;;  %v1142_v59 = vpop.f32.mrb[1].mxu0 }
  0xfd   : > { %v1182_v60 = vpop.f32.mrb[1].mxu1  ;;  %v1143_v61 = vadd.f32 %v1142_v59, %v1141_v57  ;;  %v1144_v63 = vpop.f32.mrb[2].mxu0 }
  0xfe   : > { %v1183_v62 = vadd.f32 %v1182_v60, %v1181_v58  ;;  %v1184_v0 = vpop.f32.mrb[2].mxu1  ;;  %v1145_v1 = vpop.f32.mrb[3].mxu0 }
  0xff   : > { %v1185_v2 = vpop.f32.mrb[3].mxu1  ;;  %v1146_v4 = vadd.f32 %v1145_v1, %v1144_v63 }
 0x100   : > { %v679_v3 = vadd.f32 %v1183_v62, %v1143_v61  ;;  %v1186_v5 = vadd.f32 %v1185_v2, %v1184_v0 }
 0x102   : > { %v682_v6 = vadd.f32 %v1186_v5, %v1146_v4  ;;  %v836_v7 = vmul.f32 %v679_v3, %v679_v3 }
 0x103   : > { %v1147_v11 = vpop.f32.mrb[4].mxu0 }
 0x104   : > { %v1105_v8 = vpack.c.bf16 %v682_v6, %v679_v3  ;;  %v823_v9 = vadd.f32 %v682_v6, %v679_v3  ;;  %v837_v10 = vmul.f32 %v682_v6, %v682_v6  ;;  %v1187_v12 = vpop.f32.mrb[4].mxu1  ;;  %v1148_v13 = vpop.f32.mrb[5].mxu0 }
 0x105   : > { %v1188_v14 = vpop.f32.mrb[5].mxu1  ;;  %v1149_v16 = vadd.f32 %v1148_v13, %v1147_v11  ;;  %v1150_v18 = vpop.f32.mrb[6].mxu0 }
 0x106   : > { %1106 = vst [vmem:[%s1461_s18] sm:$0xff] %v1105_v8   ;;  %v844_v15 = vadd.f32 %v837_v10, %v836_v7  ;;  %v1189_v17 = vadd.f32 %v1188_v14, %v1187_v12  ;;  %v1190_v19 = vpop.f32.mrb[6].mxu1  ;;  %v1151_v20 = vpop.f32.mrb[7].mxu0 }
 0x107   : > { %v1191_v21 = vpop.f32.mrb[7].mxu1  ;;  %v1152_v23 = vadd.f32 %v1151_v20, %v1150_v18 }
 0x108   : > { %v687_v22 = vadd.f32 %v1189_v17, %v1149_v16  ;;  %v1192_v24 = vadd.f32 %v1191_v21, %v1190_v19 }
 0x10a   : > { %v824_v25 = vadd.f32 %v823_v9, %v687_v22  ;;  %v838_v26 = vmul.f32 %v687_v22, %v687_v22  ;;  %v690_v27 = vadd.f32 %v1192_v24, %v1152_v23 }
 0x10b   : > { %v1153_v32 = vpop.f32.mrb[8].mxu0 }
 0x10c   : > { %v845_v28 = vadd.f32 %v844_v15, %v838_v26  ;;  %v1110_v29 = vpack.c.bf16 %v690_v27, %v687_v22  ;;  %v825_v30 = vadd.f32 %v824_v25, %v690_v27  ;;  %v839_v31 = vmul.f32 %v690_v27, %v690_v27  ;;  %v1193_v33 = vpop.f32.mrb[8].mxu1  ;;  %v1154_v34 = vpop.f32.mrb[9].mxu0 }
 0x10d   : > { %v1194_v35 = vpop.f32.mrb[9].mxu1  ;;  %v1155_v37 = vadd.f32 %v1154_v34, %v1153_v32  ;;  %v1156_v39 = vpop.f32.mrb[10].mxu0 }
 0x10e   : > { %1122 = vst [vmem:[%s1461_s18 + $0x8] sm:$0xff] %v1110_v29   ;;  %v846_v36 = vadd.f32 %v845_v28, %v839_v31  ;;  %v1195_v38 = vadd.f32 %v1194_v35, %v1193_v33  ;;  %v1196_v40 = vpop.f32.mrb[10].mxu1  ;;  %v1157_v41 = vpop.f32.mrb[11].mxu0 }
 0x10f   : > { %v1197_v42 = vpop.f32.mrb[11].mxu1  ;;  %v1158_v44 = vadd.f32 %v1157_v41, %v1156_v39 }
 0x110   : > { %v695_v43 = vadd.f32 %v1195_v38, %v1155_v37  ;;  %v1198_v45 = vadd.f32 %v1197_v42, %v1196_v40 }
 0x112   : > { %v826_v46 = vadd.f32 %v825_v30, %v695_v43  ;;  %v840_v47 = vmul.f32 %v695_v43, %v695_v43  ;;  %v698_v48 = vadd.f32 %v1198_v45, %v1158_v44 }
 0x113   : > { %v1159_v53 = vpop.f32.mrb[12].mxu0 }
 0x114   : > { %v847_v49 = vadd.f32 %v846_v36, %v840_v47  ;;  %v1115_v50 = vpack.c.bf16 %v698_v48, %v695_v43  ;;  %v827_v51 = vadd.f32 %v826_v46, %v698_v48  ;;  %v841_v52 = vmul.f32 %v698_v48, %v698_v48  ;;  %v1199_v54 = vpop.f32.mrb[12].mxu1  ;;  %v1160_v55 = vpop.f32.mrb[13].mxu0 }
 0x115   : > { %v1200_v56 = vpop.f32.mrb[13].mxu1  ;;  %v1161_v58 = vadd.f32 %v1160_v55, %v1159_v53  ;;  %v1162_v60 = vpop.f32.mrb[14].mxu0 }
 0x116   : > { %1123 = vst [vmem:[%s1461_s18 + $0x10] sm:$0xff] %v1115_v50   ;;  %v848_v57 = vadd.f32 %v847_v49, %v841_v52  ;;  %v1201_v59 = vadd.f32 %v1200_v56, %v1199_v54  ;;  %v1202_v61 = vpop.f32.mrb[14].mxu1  ;;  %v1163_v62 = vpop.f32.mrb[15].mxu0 }
 0x117   : > { %v1203_v63 = vpop.f32.mrb[15].mxu1  ;;  %v1164_v1 = vadd.f32 %v1163_v62, %v1162_v60 }
 0x118   : > { %v703_v0 = vadd.f32 %v1201_v59, %v1161_v58  ;;  %v1204_v2 = vadd.f32 %v1203_v63, %v1202_v61 }
 0x11a   : > { %v828_v3 = vadd.f32 %v827_v51, %v703_v0  ;;  %v842_v4 = vmul.f32 %v703_v0, %v703_v0  ;;  %v706_v5 = vadd.f32 %v1204_v2, %v1164_v1 }
 0x11c   : > { %v849_v6 = vadd.f32 %v848_v57, %v842_v4  ;;  %v1120_v7 = vpack.c.bf16 %v706_v5, %v703_v0  ;;  %v829_v8 = vadd.f32 %v828_v3, %v706_v5  ;;  %v843_v9 = vmul.f32 %v706_v5, %v706_v5 }
 0x11e   : > { %1124 = vst [vmem:[%s1461_s18 + $0x18] sm:$0xff] %v1120_v7   ;;  %v830_v10 = vrot.slane %v829_v8, 4  ;;  %v850_v11 = vadd.f32 %v849_v6, %v843_v9 }
 0x120   : > { %v831_v12 = vadd.f32 %v830_v10, %v829_v8  ;;  %v851_v13 = vrot.slane %v850_v11, 4 }
 0x122   : > { %v832_v14 = vrot.slane %v831_v12, 2  ;;  %v852_v15 = vadd.f32 %v851_v13, %v850_v11 }
 0x124   : > { %v833_v16 = vadd.f32 %v832_v14, %v831_v12  ;;  %v853_v17 = vrot.slane %v852_v15, 2 }
 0x126   : > { %v834_v18 = vrot.slane %v833_v16, 1  ;;  %v854_v19 = vadd.f32 %v853_v17, %v852_v15 }
 0x128   : > { %v855_v20 = vrot.slane %v854_v19, 1  ;;  %v835_v21 = vadd.f32 %v834_v18, %v833_v16 }
 0x12a   : > { %v856_v22 = vadd.f32 %v855_v20, %v854_v19 }
 0x12c   : > { %v858_v23 = vsel %vm857_vm0, %v835_v21, %v856_v22 }
 0x12d   : > { %859 = vst [vmem:[%s212_s22] sm:$0x3] %v858_v23 }
 0x12e PF: > { %s14_s14 = sadd.s32 1, %s1300_s14   ;;  %s1484_s12 = smov %s1296_s13 }
 0x12f   : > { %p11_p5 = scmp.ge.s32.totalorder %s14_s14, 4   ;;  %s1485_s13 = smov %s1487_s15 }
 0x131   :  { %13 = sbr.rel (!%p11_p5) target bundleno = 2 (0x2), region = 73 }

// kernel: discriminator_forward.9
= control target key start
LH: loop header
LB: loop body
LE: loop exit
PB: predicated region body
PF: predicated region fallthrough
CT: control target
= control target key end

     0   :  { %v123_v58 = vlaneseq  ;;  %vm134_vm8 = vcmask 130112   ;;  %vm141_vm9 = vcmask 195712   ;;  %vm148_vm10 = vcmask 261312   ;;  %s272_s0 = inlined_call_operand.vmem [shape: bf16[2,32,128], index: 0, kind: input, shape index: {}]   ;;  %s273_s1 = inlined_call_operand.vmem [shape: f32[1,1,128], index: 1, kind: input, shape index: {}]   ;;  %s274_s2 = inlined_call_operand.vmem [shape: f32[1,1,128], index: 2, kind: input, shape index: {}]   ;;  %s275_s3 = inlined_call_operand.vmem [shape: f32[32,128], index: 3, kind: input, shape index: {}]   ;;  %s276_s4 = inlined_call_operand.vmem [shape: f32[2,1], index: 4, kind: output, shape index: {}]  }
   0x1   :  { %v208_v0 = vld [vmem:[%s272_s0 + $0x10] sm:$0xff]   ;;  %v188_v1 = vld [vmem:[%s273_s1] ss:$0 sm:$0xff]  ;;  %v209_v8 = vld [vmem:[%s272_s0 + $0x18] sm:$0xff]   ;;  %vm169_vm11 = vcmask 1041409   ;;  %vm172_vm12 = vcmask 254976  }
   0x2   :  { %v201_v2 = vunpack.c.l.bf16 %v208_v0  ;;  %v192_v3 = vld [vmem:[%s272_s0] sm:$0xff]   ;;  %v202_v4 = vunpack.c.h.bf16 %v208_v0  ;;  %v207_v9 = vld [vmem:[%s272_s0 + $0x8] sm:$0xff]   ;;  %v205_v12 = vunpack.c.l.bf16 %v209_v8  ;;  %v206_v16 = vunpack.c.h.bf16 %v209_v8  ;;  %v89_v47 = vld [vmem:[%s275_s3 + $0x10] sm:$0xff] }
   0x3   :  { %v189_v5 = vld [vmem:[%s274_s2] ss:$0 sm:$0xff]  ;;  %v193_v6 = vunpack.c.l.bf16 %v192_v3  ;;  %v194_v7 = vunpack.c.h.bf16 %v192_v3  ;;  %v197_v13 = vunpack.c.l.bf16 %v207_v9  ;;  %v198_v17 = vunpack.c.h.bf16 %v207_v9  ;;  %v88_v24 = vld [vmem:[%s275_s3 + $0x8] sm:$0xff]  ;;  %v90_v54 = vld [vmem:[%s275_s3 + $0x18] sm:$0xff] }
   0x4   :  { %v44_v10 = vmul.f32 %v201_v2, %v188_v1  ;;  %v45_v11 = vmul.f32 %v202_v4, %v188_v1  ;;  %v46_v20 = vmul.f32 %v205_v12, %v188_v1  ;;  %v87_v22 = vld [vmem:[%s275_s3] sm:$0xff]  ;;  %v47_v26 = vmul.f32 %v206_v16, %v188_v1 }
   0x5   :  { %v40_v14 = vmul.f32 %v193_v6, %v188_v1  ;;  %v41_v15 = vmul.f32 %v194_v7, %v188_v1  ;;  %v42_v21 = vmul.f32 %v197_v13, %v188_v1  ;;  %v43_v27 = vmul.f32 %v198_v17, %v188_v1 }
   0x6   :  { %v59_v18 = vadd.f32 %v189_v5, %v44_v10  ;;  %v60_v19 = vadd.f32 %v189_v5, %v45_v11  ;;  %v61_v34 = vadd.f32 %v189_v5, %v46_v20  ;;  %v62_v43 = vadd.f32 %v189_v5, %v47_v26 }
   0x7   :  { %v55_v23 = vadd.f32 %v189_v5, %v40_v14  ;;  %v56_v25 = vadd.f32 %v189_v5, %v41_v15  ;;  %v57_v35 = vadd.f32 %v189_v5, %v42_v21  ;;  %v58_v44 = vadd.f32 %v189_v5, %v43_v27 }
   0x8   :  { %vm67_vm0 = vcmp.ge.f32.partialorder %v59_v18, 0.0  ;;  %v75_v28 = vmul.f32 0.2, %v59_v18  ;;  %vm68_vm1 = vcmp.ge.f32.partialorder %v60_v19, 0.0  ;;  %v76_v29 = vmul.f32 0.2, %v60_v19 }
   0x9   :  { %vm63_vm2 = vcmp.ge.f32.partialorder %v55_v23, 0.0  ;;  %v71_v30 = vmul.f32 0.2, %v55_v23  ;;  %vm64_vm3 = vcmp.ge.f32.partialorder %v56_v25, 0.0  ;;  %v72_v31 = vmul.f32 0.2, %v56_v25 }
   0xa   :  { %v83_v32 = vsel %vm67_vm0, %v59_v18, %v75_v28  ;;  %v84_v33 = vsel %vm68_vm1, %v60_v19, %v76_v29  ;;  %vm69_vm4 = vcmp.ge.f32.partialorder %v61_v34, 0.0  ;;  %v77_v41 = vmul.f32 0.2, %v61_v34 }
   0xb   :  { %v95_v36 = vmul.f32 %v87_v22, %v83_v32  ;;  %v79_v37 = vsel %vm63_vm2, %v55_v23, %v71_v30  ;;  %v80_v38 = vsel %vm64_vm3, %v56_v25, %v72_v31  ;;  %v96_v40 = vmul.f32 %v88_v24, %v84_v33 }
   0xc   :  { %v91_v39 = vmul.f32 %v87_v22, %v79_v37  ;;  %vm65_vm5 = vcmp.ge.f32.partialorder %v57_v35, 0.0  ;;  %v73_v42 = vmul.f32 0.2, %v57_v35  ;;  %v92_v45 = vmul.f32 %v88_v24, %v80_v38 }
   0xd   :  { %107 = vadd.xlane.f32.xlu1 %v95_v36  ;;  %v85_v46 = vsel %vm69_vm4, %v61_v34, %v77_v41  ;;  %vm70_vm6 = vcmp.ge.f32.partialorder %v62_v43, 0.0  ;;  %v78_v49 = vmul.f32 0.2, %v62_v43  ;;  %vm66_vm7 = vcmp.ge.f32.partialorder %v58_v44, 0.0 }
   0xe   :  { %99 = vadd.xlane.f32.xlu0 %v91_v39  ;;  %v81_v48 = vsel %vm65_vm5, %v57_v35, %v73_v42  ;;  %v74_v50 = vmul.f32 0.2, %v58_v44  ;;  %v97_v51 = vmul.f32 %v89_v47, %v85_v46  ;;  %v124_v59 = vand.u32 127, %v123_v58 }
   0xf   :  { %v93_v52 = vmul.f32 %v89_v47, %v81_v48  ;;  %v86_v53 = vsel %vm70_vm6, %v62_v43, %v78_v49  ;;  %v126_v0 = vshrl.u32 %v123_v58, 7  ;;  %vm182_vm13 = vcmask 1024  }
  0x10   :  { %v82_v55 = vsel %vm66_vm7, %v58_v44, %v74_v50  ;;  %v98_v56 = vmul.f32 %v90_v54, %v86_v53  ;;  %v129_v62 = vadd.s32 4294967288, %v124_v59  ;;  %v136_v63 = vadd.s32 4294967280, %v124_v59 }
  0x11   :  { %109 = vadd.xlane.f32.xlu1 %v96_v40  ;;  %v94_v57 = vmul.f32 %v90_v54, %v82_v55  ;;  %v143_v4 = vadd.s32 4294967272, %v124_v59  ;;  %v127_v6 = vsub.s32 %v124_v59, %v126_v0 }
  0x12   :  { %101 = vadd.xlane.f32.xlu0 %v92_v45  ;;  %v132_v2 = vsub.s32 %v129_v62, %v126_v0  ;;  %v139_v5 = vsub.s32 %v136_v63, %v126_v0 }
  0x13   :  { %v146_v10 = vsub.s32 %v143_v4, %v126_v0 }
  0x15   :  { %111 = vadd.xlane.f32.xlu1 %v97_v51 }
  0x16   :  { %103 = vadd.xlane.f32.xlu0 %v93_v52 }
  0x19   :  { %113 = vadd.xlane.f32.xlu1 %v98_v56 }
  0x1a   :  { %105 = vadd.xlane.f32.xlu0 %v94_v57 }
  0x9a   :  { %v108_v60 = vpop.xlane.xlu1 %107 }
  0x9b   :  { %v100_v61 = vpop.xlane.xlu0 %99  ;;  %v153_v13 = vrot.slane %v108_v60, %v127_v6 }
  0x9c   :  { %v128_v15 = vrot.slane %v100_v61, %v127_v6 }
  0x9e   :  { %v110_v1 = vpop.xlane.xlu1 %109 }
  0x9f   :  { %v102_v3 = vpop.xlane.xlu0 %101  ;;  %v157_v8 = vrot.slane %v110_v1, %v132_v2 }
  0xa0   :  { %v133_v11 = vrot.slane %v102_v3, %v132_v2 }
  0xa1   :  { %v158_v17 = vsel %vm134_vm8, %v157_v8, %v153_v13 }
  0xa2   :  { %v112_v7 = vpop.xlane.xlu1 %111  ;;  %v135_v20 = vsel %vm134_vm8, %v133_v11, %v128_v15 }
  0xa3   :  { %v104_v9 = vpop.xlane.xlu0 %103  ;;  %v162_v12 = vrot.slane %v112_v7, %v139_v5 }
  0xa4   :  { %v140_v14 = vrot.slane %v104_v9, %v139_v5 }
  0xa5   :  { %v163_v21 = vsel %vm141_vm9, %v162_v12, %v158_v17 }
  0xa6   :  { %v114_v16 = vpop.xlane.xlu1 %113  ;;  %v142_v23 = vsel %vm141_vm9, %v140_v14, %v135_v20 }
  0xa7   :  { %v167_v18 = vrot.slane %v114_v16, %v146_v10  ;;  %v106_v19 = vpop.xlane.xlu0 %105 }
  0xa8   :  { %v147_v22 = vrot.slane %v106_v19, %v146_v10 }
  0xa9   :  { %v168_v24 = vsel %vm148_vm10, %v167_v18, %v163_v21 }
  0xaa   :  { %v149_v25 = vsel %vm148_vm10, %v147_v22, %v142_v23 }
  0xab   :  { %v170_v26 = vsel %vm169_vm11, %v168_v24, %v149_v25 }
  0xac   :  { %v173_v27 = vsel %vm172_vm12, %v170_v26, 0.0 }
  0xad   :  { %174 = vadd.xlane.f32.xlu0 %v173_v27 }
 0x13a   :  { %v175_v28 = vpop.xlane.xlu0 %174 }
 0x13b   :  { %v190_v29 = vmul.f32 -1.442695, %v175_v28 }
 0x13d   :  { %210 = vpow2.f32 %v190_v29 }
 0x147   :  { %v211_v30 = vpop.eup %210 }
 0x148   :  { %v179_v31 = vadd.f32 1.0, %v211_v30 }
 0x14a   :  { %212 = vrcp.f32 %v179_v31 }
 0x154   :  { %v213_v32 = vpop.eup %212 }
 0x155   :  { %183 = vst.msk [vmem:[%s276_s4] sm:$0x3] %vm182_vm13, %v213_v32 }

// kernel: discriminator_forward.8
= control target key start
LH: loop header
LB: loop body
LE: loop exit
PB: predicated region body
PF: predicated region fallthrough
CT: control target
= control target key end

     0   :  { %s1690_s12 = smov 0   ;;  %s1692_s13 = smov 0   ;;  %s1967_s0 = inlined_call_operand.vmem [shape: bf16[2,40,512], index: 0, kind: input, shape index: {}]   ;;  %s1968_s1 = inlined_call_operand.vmem [shape: bf16[2,512,128], index: 1, kind: input, shape index: {}]   ;;  %s1969_s2 = inlined_call_operand.vmem [shape: bf16[2,32,128], index: 2, kind: output, shape index: {0}]   ;;  %s1970_s3 = inlined_call_operand.vmem [shape: f32[2,1,2,128], index: 3, kind: output, shape index: {1}]  }
   0x1   :  { %s1694_s14 = smov 0  }
   0x2 LB: > { %s26_s15 = sadd.s32 1, %s1663_s13  ;;  %p1244_p0 = scmp.ge.s32.totalorder %s1667_s14, 1  ;;  %s1667_s14 = sphi %s1694_s14, %s14_s14   ;;  %s1663_s13 = sphi %s1692_s13, %s1972_s13   ;;  %s1659_s12 = sphi %s1690_s12, %s1971_s12  }
   0x3   : > { %p28_p1 = scmp.ge.s32.totalorder %s26_s15, 2  ;;  %p156_p2 = scmp.lt.s32.totalorder %s1667_s14, 3 }
   0x5   : > { %s1974_s15 = smov (%p28_p1, %s26_s15), 0  ;;  %p157_p3 = pnand %p1244_p0, %p156_p2 }
   0x6   : > { %v1565_v0 = vld [vmem:[%s1968_s1 + $0x140] sm:$0xff] (!%p157_p3)   ;;  %v1569_v4 = vld [vmem:[%s1968_s1 + $0x148] sm:$0xff] (!%p157_p3)   ;;  %v1573_v8 = vld [vmem:[%s1968_s1 + $0x150] sm:$0xff] (!%p157_p3)   ;;  %p191_p4 = scmp.lt.s32.totalorder (!%p157_p3), %s1659_s12, 1  ;;  %vm1111_vm4 = vcmask (!%p157_p3), 1040384  }
   0x7   : > { %160 = sbr.rel (%p157_p3) target bundleno = 321 (0x141), region = 28  ;;  %v1566_v1 = vld [vmem:[%s1968_s1 + $0x1c0] sm:$0xff] (!%p157_p3)   ;;  %1427 = vmatprep.subr.bf16.mxu0 (!%p157_p3), %v1565_v0  ;;  %v1570_v5 = vld [vmem:[%s1968_s1 + $0x1c8] sm:$0xff] (!%p157_p3)   ;;  %v1574_v9 = vld [vmem:[%s1968_s1 + $0x1d0] sm:$0xff] (!%p157_p3)  }
   0x8   : > { %v1567_v2 = vld [vmem:[%s1968_s1 + $0x100] sm:$0xff] (!%p157_p3)   ;;  %1455 = vmatprep.subr.bf16.mxu1 (!%p157_p3), %v1566_v1  ;;  %v1571_v6 = vld [vmem:[%s1968_s1 + $0x108] sm:$0xff] (!%p157_p3)   ;;  %v1575_v10 = vld [vmem:[%s1968_s1 + $0x110] sm:$0xff] (!%p157_p3)  }
   0x9   : > { %v1568_v3 = vld [vmem:[%s1968_s1 + $0x180] sm:$0xff] (!%p157_p3)   ;;  %1428 = vmatpush3.bf16.msra.mxu0 (!%p157_p3), %v1567_v2  ;;  %v1572_v7 = vld [vmem:[%s1968_s1 + $0x188] sm:$0xff] (!%p157_p3)   ;;  %v1576_v11 = vld [vmem:[%s1968_s1 + $0x190] sm:$0xff] (!%p157_p3)  }
   0xa   : > { %1456 = vmatpush3.bf16.msra.mxu1 (!%p157_p3), %v1568_v3  ;;  %1429 = vmatprep.subr.bf16.mxu0 (!%p157_p3), %v1569_v4  ;;  %v1577_v12 = vld [vmem:[%s1968_s1 + $0x158] sm:$0xff] (!%p157_p3)   ;;  %v1581_v16 = vld [vmem:[%s1968_s1 + $0x160] sm:$0xff] (!%p157_p3)   ;;  %v1585_v20 = vld [vmem:[%s1968_s1 + $0x168] sm:$0xff] (!%p157_p3)  }
   0xb   : > { %1457 = vmatprep.subr.bf16.mxu1 (!%p157_p3), %v1570_v5  ;;  %v1578_v13 = vld [vmem:[%s1968_s1 + $0x1d8] sm:$0xff] (!%p157_p3)   ;;  %v1582_v17 = vld [vmem:[%s1968_s1 + $0x1e0] sm:$0xff] (!%p157_p3)   ;;  %v1586_v21 = vld [vmem:[%s1968_s1 + $0x1e8] sm:$0xff] (!%p157_p3)  }
   0xc   : > { %v1579_v14 = vld [vmem:[%s1968_s1 + $0x118] sm:$0xff] (!%p157_p3)   ;;  %v1583_v18 = vld [vmem:[%s1968_s1 + $0x120] sm:$0xff] (!%p157_p3)   ;;  %v1587_v22 = vld [vmem:[%s1968_s1 + $0x128] sm:$0xff] (!%p157_p3)  }
   0xd   : > { %1430 = vmatpush3.bf16.msra.mxu0 (!%p157_p3), %v1571_v6  ;;  %v1580_v15 = vld [vmem:[%s1968_s1 + $0x198] sm:$0xff] (!%p157_p3)   ;;  %v1584_v19 = vld [vmem:[%s1968_s1 + $0x1a0] sm:$0xff] (!%p157_p3)   ;;  %v1588_v23 = vld [vmem:[%s1968_s1 + $0x1a8] sm:$0xff] (!%p157_p3)  }
   0xe   : > { %1458 = vmatpush3.bf16.msra.mxu1 %v1572_v7  ;;  %1431 = vmatprep.subr.bf16.mxu0 %v1573_v8  ;;  %s1976_s12 = smov (!%p191_p4, %s1659_s12), 1  ;;  %v1589_v24 = vld [vmem:[%s1968_s1 + $0x170] sm:$0xff]   ;;  %v1593_v28 = vld [vmem:[%s1968_s1 + $0x178] sm:$0xff]   ;;  %v1601_v40 = vld [vmem:[%s1968_s1 + $0x40] sm:$0xff]  }
   0xf   : > { %1459 = vmatprep.subr.bf16.mxu1 %v1574_v9  ;;  %v1590_v25 = vld [vmem:[%s1968_s1 + $0x1f0] sm:$0xff]   ;;  %s1539_s22 = smul.u32 80, %s1976_s12  ;;  %v1594_v29 = vld [vmem:[%s1968_s1 + $0x1f8] sm:$0xff]   ;;  %v1602_v41 = vld [vmem:[%s1968_s1 + $0xc0] sm:$0xff]   ;;  %s1248_s16 = sshll.u32 %s1976_s12, 1 }
  0x10   : > { %v1591_v26 = vld [vmem:[%s1968_s1 + $0x130] sm:$0xff]   ;;  %v1595_v30 = vld [vmem:[%s1968_s1 + $0x138] sm:$0xff]   ;;  %v1603_v42 = vld [vmem:[%s1968_s1] sm:$0xff]   ;;  %s212_s19 = scalar_lea.vmem %s1970_s3, %s1248_s16 }
  0x11   : > { %1432 = vmatpush3.bf16.msra.mxu0 %v1575_v10  ;;  %v1592_v27 = vld [vmem:[%s1968_s1 + $0x1b0] sm:$0xff]   ;;  %s1808_s6 = scalar_lea.vmem %s1967_s0, %s1539_s22  ;;  %v1596_v31 = vld [vmem:[%s1968_s1 + $0x1b8] sm:$0xff]   ;;  %v1604_v43 = vld [vmem:[%s1968_s1 + $0x80] sm:$0xff]  }
  0x12   : > { %1460 = vmatpush3.bf16.msra.mxu1 %v1576_v11  ;;  %1433 = vmatprep.subr.bf16.mxu0 %v1577_v12  ;;  %v1817_v32 = vld [vmem:[%s1808_s6 + $0x10] sm:$0xff]  ;;  %v1820_v33 = vld [vmem:[%s1808_s6 + $0x20] sm:$0xff]  ;;  %v1823_v34 = vld [vmem:[%s1808_s6 + $0x18] sm:$0xff] }
  0x13   : > { %1461 = vmatprep.subr.bf16.mxu1 %v1578_v13  ;;  %v1321_v35 = vcombine.low %v1817_v32, %v1820_v33  ;;  %v1322_v36 = vcombine.high %v1817_v32, %v1820_v33  ;;  %v1830_v37 = vld [vmem:[%s1808_s6 + $0x28] sm:$0xff]  ;;  %v1609_v48 = vld [vmem:[%s1968_s1 + $0x50] sm:$0xff]   ;;  %v1613_v52 = vld [vmem:[%s1968_s1 + $0x58] sm:$0xff]  }
  0x14   : > { %v1323_v38 = vcombine.low %v1823_v34, %v1830_v37  ;;  %v1324_v39 = vcombine.high %v1823_v34, %v1830_v37  ;;  %v1605_v44 = vld [vmem:[%s1968_s1 + $0x48] sm:$0xff]   ;;  %v1610_v49 = vld [vmem:[%s1968_s1 + $0xd0] sm:$0xff]   ;;  %v1614_v53 = vld [vmem:[%s1968_s1 + $0xd8] sm:$0xff]  }
  0x15   : > { %1434 = vmatpush3.bf16.msra.mxu0 %v1579_v14  ;;  %635 = vmatprep.mubr.bf16.mxu0 %v1322_v36  ;;  %v1606_v45 = vld [vmem:[%s1968_s1 + $0xc8] sm:$0xff]   ;;  %v1611_v50 = vld [vmem:[%s1968_s1 + $0x10] sm:$0xff]   ;;  %v1615_v54 = vld [vmem:[%s1968_s1 + $0x18] sm:$0xff]  }
  0x16   : > { %1462 = vmatpush3.bf16.msra.mxu1 %v1580_v15  ;;  %1435 = vmatprep.subr.bf16.mxu0 %v1581_v16  ;;  %v1607_v46 = vld [vmem:[%s1968_s1 + $0x8] sm:$0xff]   ;;  %v1612_v51 = vld [vmem:[%s1968_s1 + $0x90] sm:$0xff]   ;;  %v1616_v55 = vld [vmem:[%s1968_s1 + $0x98] sm:$0xff]  }
  0x17   : > { %1463 = vmatprep.subr.bf16.mxu1 %v1582_v17  ;;  %684 = vmatprep.mubr.bf16.mxu1 %v1324_v39  ;;  %v1608_v47 = vld [vmem:[%s1968_s1 + $0x88] sm:$0xff]   ;;  %v1617_v56 = vld [vmem:[%s1968_s1 + $0x60] sm:$0xff]   ;;  %v1253_v60 = vld [vmem:[%s1808_s6 + $0x30] sm:$0xff] }
  0x18   : > { %v1618_v57 = vld [vmem:[%s1968_s1 + $0xe0] sm:$0xff]   ;;  %v1254_v63 = vld [vmem:[%s1808_s6 + $0x38] sm:$0xff]  ;;  %v1256_v0 = vld [vmem:[%s1808_s6 + $0x48] sm:$0xff] }
  0x19   : > { %1436 = vmatpush3.bf16.msra.mxu0 %v1583_v18  ;;  %v1619_v58 = vld [vmem:[%s1968_s1 + $0x20] sm:$0xff]   ;;  %v1328_v2 = vcombine.high %v1254_v63, %v1256_v0  ;;  %v1623_v3 = vld [vmem:[%s1968_s1 + $0x68] sm:$0xff]   ;;  %v1327_v4 = vcombine.low %v1254_v63, %v1256_v0  ;;  %v1629_v8 = vld [vmem:[%s1968_s1 + $0x70] sm:$0xff]  }
  0x1a   : > { %1464 = vmatpush3.bf16.msra.mxu1 %v1584_v19  ;;  %1437 = vmatprep.subr.bf16.mxu0 %v1585_v20  ;;  %v1620_v59 = vld [vmem:[%s1968_s1 + $0xa0] sm:$0xff]   ;;  %v1624_v5 = vld [vmem:[%s1968_s1 + $0xe8] sm:$0xff]   ;;  %v1630_v9 = vld [vmem:[%s1968_s1 + $0xf0] sm:$0xff]   ;;  %v1366_v20 = vcombine.high %v1820_v33, %v1253_v60 }
  0x1b   : > { %1465 = vmatprep.subr.bf16.mxu1 %v1586_v21  ;;  %v1255_v61 = vld [vmem:[%s1808_s6 + $0x40] sm:$0xff]  ;;  %v1627_v6 = vld [vmem:[%s1968_s1 + $0x28] sm:$0xff]   ;;  %v1631_v10 = vld [vmem:[%s1968_s1 + $0x30] sm:$0xff]  }
  0x1c   : > { %v1326_v62 = vcombine.high %v1253_v60, %v1255_v61  ;;  %v1325_v1 = vcombine.low %v1253_v60, %v1255_v61  ;;  %v1628_v7 = vld [vmem:[%s1968_s1 + $0xa8] sm:$0xff]   ;;  %v1632_v11 = vld [vmem:[%s1968_s1 + $0xb0] sm:$0xff]   ;;  %v1633_v12 = vld [vmem:[%s1968_s1 + $0x78] sm:$0xff]  }
  0x1d   : > { %1438 = vmatpush3.bf16.msra.mxu0 %v1587_v22  ;;  %v1634_v13 = vld [vmem:[%s1968_s1 + $0xf8] sm:$0xff]   ;;  %v220_v16 = vld [vmem:[%s1808_s6] sm:$0xff]  ;;  %v221_v19 = vld [vmem:[%s1808_s6 + $0x8] sm:$0xff]  ;;  %s1411_s6 = sshll.u32 %s1976_s12, 4 }
  0x1e   : > { %1466 = vmatpush3.bf16.msra.mxu1 %v1588_v23  ;;  %1439 = vmatprep.subr.bf16.mxu0 %v1589_v24  ;;  %v1635_v14 = vld [vmem:[%s1968_s1 + $0x38] sm:$0xff]   ;;  %v1361_v17 = vcombine.low %v220_v16, %v1817_v32  ;;  %v1362_v18 = vcombine.high %v220_v16, %v1817_v32  ;;  %v1363_v21 = vcombine.low %v221_v19, %v1823_v34  ;;  %s1950_s11 = scalar_lea.vmem %s1969_s2, %s1411_s6 }
  0x1f   : > { %1467 = vmatprep.subr.bf16.mxu1 %v1590_v25  ;;  %v1636_v15 = vld [vmem:[%s1968_s1 + $0xb8] sm:$0xff]   ;;  %v1364_v22 = vcombine.high %v221_v19, %v1823_v34  ;;  %v1368_v23 = vcombine.high %v1830_v37, %v1254_v63  ;;  %v1365_v24 = vcombine.low %v1820_v33, %v1253_v60  ;;  %v1367_v25 = vcombine.low %v1830_v37, %v1254_v63 }
  0x20   : > { %v1051_v33 = vlaneseq }
  0x21   : > { %1440 = vmatpush3.bf16.msra.mxu0 %v1591_v26 }
  0x22   : > { %1468 = vmatpush3.bf16.msra.mxu1 %v1592_v27  ;;  %1441 = vmatprep.subr.bf16.mxu0 %v1593_v28 }
  0x23   : > { %1469 = vmatprep.subr.bf16.mxu1 %v1594_v29 }
  0x25   : > { %1442 = vmatpush3.bf16.msra.mxu0 %v1595_v30 }
  0x26   : > { %1470 = vmatpush3.bf16.msra.mxu1 %v1596_v31  ;;  %1483 = vmatprep.subr.bf16.mxu0 %v1601_v40 }
  0x27   : > { %1511 = vmatprep.subr.bf16.mxu1 %v1602_v41 }
  0x28   : > { %636 = vmatmul.mubr.bf16.vlgmr.msra.gmra.mrb[0].mxu0 %v1321_v35 }
  0x29   : > { %685 = vmatmul.mubr.bf16.vlgmr.msra.gmra.mrb[0].mxu1 %v1323_v38  ;;  %1484 = vmatpush3.bf16.msra.mxu0 %v1603_v42 }
  0x2a   : > { %1512 = vmatpush3.bf16.msra.mxu1 %v1604_v43  ;;  %1485 = vmatprep.subr.bf16.mxu0 %v1605_v44 }
  0x2b   : > { %1513 = vmatprep.subr.bf16.mxu1 %v1606_v45  ;;  %643 = vmatprep.mubr.bf16.mxu0 %v1326_v62 }
  0x2c   : > { %692 = vmatprep.mubr.bf16.mxu1 %v1328_v2 }
  0x2d   : > { %1486 = vmatpush3.bf16.msra.mxu0 %v1607_v46 }
  0x2e   : > { %1514 = vmatpush3.bf16.msra.mxu1 %v1608_v47  ;;  %1487 = vmatprep.subr.bf16.mxu0 %v1609_v48 }
  0x2f   : > { %1515 = vmatprep.subr.bf16.mxu1 %v1610_v49 }
  0x30   : > { %644 = vmatmul.mubr.bf16.gmra.mrb[4].mxu0 %v1325_v1 }
  0x31   : > { %1488 = vmatpush3.bf16.msra.mxu0 %v1611_v50  ;;  %693 = vmatmul.mubr.bf16.gmra.mrb[4].mxu1 %v1327_v4 }
  0x32   : > { %1516 = vmatpush3.bf16.msra.mxu1 %v1612_v51  ;;  %1489 = vmatprep.subr.bf16.mxu0 %v1613_v52  ;;  %v1052_v52 = vshrl.u32 %v1051_v33, 7 }
  0x33   : > { %1517 = vmatprep.subr.bf16.mxu1 %v1614_v53  ;;  %965 = vmatprep.mubr.bf16.mxu0 %v1362_v18 }
  0x34   : > { %1014 = vmatprep.mubr.bf16.mxu1 %v1364_v22  ;;  %v1054_v1 = vadd.s32 16, %v1052_v52 }
  0x35   : > { %1490 = vmatpush3.bf16.msra.mxu0 %v1615_v54 }
  0x36   : > { %1518 = vmatpush3.bf16.msra.mxu1 %v1616_v55  ;;  %1491 = vmatprep.subr.bf16.mxu0 %v1617_v56  ;;  %v1053_v56 = vadd.s32 8, %v1052_v52 }
  0x37   : > { %1519 = vmatprep.subr.bf16.mxu1 %v1618_v57  ;;  %v1061_v57 = vand.u32 7, %v1052_v52 }
  0x39   : > { %1492 = vmatpush3.bf16.msra.mxu0 %v1619_v58  ;;  %vm1065_vm0 = vcmp.lt.s32.totalorder %v1061_v57, 4 }
  0x3a   : > { %1520 = vmatpush3.bf16.msra.mxu1 %v1620_v59  ;;  %1493 = vmatprep.subr.bf16.mxu0 %v1623_v3  ;;  %v1062_v59 = vand.u32 7, %v1053_v56 }
  0x3b   : > { %1521 = vmatprep.subr.bf16.mxu1 %v1624_v5  ;;  %v1055_v5 = vadd.s32 24, %v1052_v52 }
  0x3c   : > { %vm1066_vm1 = vcmp.lt.s32.totalorder %v1062_v59, 4 }
  0x3d   : > { %1494 = vmatpush3.bf16.msra.mxu0 %v1627_v6  ;;  %v1064_v16 = vand.u32 7, %v1055_v5 }
  0x3e   : > { %1522 = vmatpush3.bf16.msra.mxu1 %v1628_v7  ;;  %1495 = vmatprep.subr.bf16.mxu0 %v1629_v8 }
  0x3f   : > { %1523 = vmatprep.subr.bf16.mxu1 %v1630_v9  ;;  %v1669_v9 = vmov 0.0   ;;  %vm1068_vm3 = vcmp.lt.s32.totalorder %v1064_v16, 4 }
  0x40   : > { %v1408_v33 = vsel %vm1068_vm3, 1.0, %v1669_v9 }
  0x41   : > { %1496 = vmatpush3.bf16.msra.mxu0 %v1631_v10  ;;  %v1405_v10 = vsel %vm1065_vm0, 1.0, %v1669_v9 }
  0x42   : > { %1524 = vmatpush3.bf16.msra.mxu1 %v1632_v11  ;;  %1497 = vmatprep.subr.bf16.mxu0 %v1633_v12 }
  0x43   : > { %1525 = vmatprep.subr.bf16.mxu1 %v1634_v13 }
  0x45   : > { %1498 = vmatpush3.bf16.msra.mxu0 %v1635_v14  ;;  %v1063_v14 = vand.u32 7, %v1054_v1 }
  0x46   : > { %1526 = vmatpush3.bf16.msra.mxu1 %v1636_v15  ;;  %v1406_v15 = vsel %vm1066_vm1, 1.0, %v1669_v9 }
  0x47   : > { %vm1067_vm2 = vcmp.lt.s32.totalorder %v1063_v14, 4 }
  0x48   : > { %966 = vmatmul.mubr.bf16.vlgmr.msra.gmra.mrb[8].mxu0 %v1361_v17 }
  0x49   : > { %1015 = vmatmul.mubr.bf16.vlgmr.msra.gmra.mrb[8].mxu1 %v1363_v21  ;;  %973 = vmatprep.mubr.bf16.mxu0 %v1366_v20 }
  0x4a   : > { %1022 = vmatprep.mubr.bf16.mxu1 %v1368_v23 }
  0x50   : > { %974 = vmatmul.mubr.bf16.gmra.mrb[12].mxu0 %v1365_v24 }
  0x51   : > { %1023 = vmatmul.mubr.bf16.gmra.mrb[12].mxu1 %v1367_v25 }
  0xfb   : > { %v1443_v26 = vpop.f32.mrb[0].mxu0 }
  0xfc   : > { %v1471_v27 = vpop.f32.mrb[0].mxu1  ;;  %v1444_v28 = vpop.f32.mrb[1].mxu0 }
  0xfd   : > { %v1445_v29 = vadd.f32 %v1444_v28, %v1443_v26  ;;  %v1472_v30 = vpop.f32.mrb[1].mxu1  ;;  %v1446_v31 = vpop.f32.mrb[2].mxu0 }
  0xfe   : > { %v1473_v32 = vadd.f32 %v1472_v30, %v1471_v27  ;;  %v1474_v34 = vpop.f32.mrb[2].mxu1  ;;  %v1447_v35 = vpop.f32.mrb[3].mxu0 }
  0xff   : > { %v1448_v36 = vadd.f32 %v1447_v35, %v1446_v31  ;;  %v1475_v38 = vpop.f32.mrb[3].mxu1 }
 0x100   : > { %v687_v39 = vadd.f32 %v1473_v32, %v1445_v29  ;;  %v1476_v40 = vadd.f32 %v1475_v38, %v1474_v34  ;;  %v1407_v38 = vsel %vm1067_vm2, 1.0, %v1669_v9 }
 0x102   : > { %v690_v41 = vadd.f32 %v1476_v40, %v1448_v36 }
 0x103   : > { %v1449_v42 = vpop.f32.mrb[4].mxu0 }
 0x104   : > { %v1477_v43 = vpop.f32.mrb[4].mxu1  ;;  %v1450_v37 = vpop.f32.mrb[5].mxu0 }
 0x105   : > { %v1451_v44 = vadd.f32 %v1450_v37, %v1449_v42  ;;  %v1478_v45 = vpop.f32.mrb[5].mxu1  ;;  %v1452_v46 = vpop.f32.mrb[6].mxu0 }
 0x106   : > { %v1479_v47 = vadd.f32 %v1478_v45, %v1477_v43  ;;  %v1480_v48 = vpop.f32.mrb[6].mxu1  ;;  %v1453_v49 = vpop.f32.mrb[7].mxu0 }
 0x107   : > { %v1454_v50 = vadd.f32 %v1453_v49, %v1452_v46  ;;  %v1481_v51 = vpop.f32.mrb[7].mxu1 }
 0x108   : > { %v695_v53 = vadd.f32 %v1479_v47, %v1451_v44  ;;  %v1482_v54 = vadd.f32 %v1481_v51, %v1480_v48 }
 0x10a   : > { %v698_v55 = vadd.f32 %v1482_v54, %v1454_v50 }
 0x11b   : > { %v1499_v58 = vpop.f32.mrb[8].mxu0 }
 0x11c   : > { %v1527_v60 = vpop.f32.mrb[8].mxu1  ;;  %v1500_v61 = vpop.f32.mrb[9].mxu0 }
 0x11d   : > { %v1501_v62 = vadd.f32 %v1500_v61, %v1499_v58  ;;  %v1528_v63 = vpop.f32.mrb[9].mxu1  ;;  %v1502_v0 = vpop.f32.mrb[10].mxu0 }
 0x11e   : > { %v1529_v2 = vadd.f32 %v1528_v63, %v1527_v60  ;;  %v1530_v3 = vpop.f32.mrb[10].mxu1  ;;  %v1503_v4 = vpop.f32.mrb[11].mxu0 }
 0x11f   : > { %v968_v6 = vadd.f32 %v1501_v62, %v687_v39  ;;  %v1504_v7 = vadd.f32 %v1503_v4, %v1502_v0  ;;  %v1531_v8 = vpop.f32.mrb[11].mxu1 }
 0x120   : > { %v1532_v11 = vadd.f32 %v1531_v8, %v1530_v3 }
 0x121   : > { %v1017_v12 = vadd.f32 %v1529_v2, %v968_v6  ;;  %v971_v13 = vadd.f32 %v1504_v7, %v690_v41 }
 0x123   : > { %v1085_v17 = vmul.f32 %v1405_v10, %v1017_v12  ;;  %v1020_v18 = vadd.f32 %v1532_v11, %v971_v13  ;;  %v1505_v19 = vpop.f32.mrb[12].mxu0 }
 0x124   : > { %v1533_v20 = vpop.f32.mrb[12].mxu1  ;;  %v1506_v21 = vpop.f32.mrb[13].mxu0 }
 0x125   : > { %v1419_v22 = vpack.c.bf16 %v1020_v18, %v1017_v12  ;;  %v1086_v23 = vmul.f32 %v1406_v15, %v1020_v18  ;;  %v1507_v24 = vadd.f32 %v1506_v21, %v1505_v19  ;;  %v1534_v25 = vpop.f32.mrb[13].mxu1  ;;  %v1508_v26 = vpop.f32.mrb[14].mxu0  ;;  %v1098_v27 = vmul.f32 %v1085_v17, %v1017_v12 }
 0x126   : > { %v1535_v28 = vadd.f32 %v1534_v25, %v1533_v20  ;;  %v1536_v29 = vpop.f32.mrb[14].mxu1  ;;  %v1509_v30 = vpop.f32.mrb[15].mxu0 }
 0x127   : > { %1420 = vst [vmem:[%s1950_s11] sm:$0xff] %v1419_v22   ;;  %v1089_v31 = vadd.f32 %v1086_v23, %v1085_v17  ;;  %v1099_v32 = vmul.f32 %v1086_v23, %v1020_v18  ;;  %v976_v34 = vadd.f32 %v1507_v24, %v695_v53  ;;  %v1510_v35 = vadd.f32 %v1509_v30, %v1508_v26  ;;  %v1537_v36 = vpop.f32.mrb[15].mxu1 }
 0x128   : > { %v1538_v39 = vadd.f32 %v1537_v36, %v1536_v29 }
 0x129   : > { %v1102_v40 = vadd.f32 %v1099_v32, %v1098_v27  ;;  %v1025_v41 = vadd.f32 %v1535_v28, %v976_v34  ;;  %v979_v42 = vadd.f32 %v1510_v35, %v698_v55 }
 0x12b   : > { %v1087_v43 = vmul.f32 %v1407_v38, %v1025_v41  ;;  %v1028_v37 = vadd.f32 %v1538_v39, %v979_v42 }
 0x12d   : > { %v1090_v44 = vadd.f32 %v1089_v31, %v1087_v43  ;;  %v1100_v45 = vmul.f32 %v1087_v43, %v1025_v41  ;;  %v1424_v46 = vpack.c.bf16 %v1028_v37, %v1025_v41  ;;  %v1088_v47 = vmul.f32 %v1408_v33, %v1028_v37 }
 0x12f   : > { %v1103_v48 = vadd.f32 %v1102_v40, %v1100_v45  ;;  %1426 = vst [vmem:[%s1950_s11 + $0x8] sm:$0xff] %v1424_v46   ;;  %v1091_v49 = vadd.f32 %v1090_v44, %v1088_v47  ;;  %v1101_v50 = vmul.f32 %v1088_v47, %v1028_v37 }
 0x131   : > { %v1092_v51 = vrot.slane %v1091_v49, 4  ;;  %v1104_v52 = vadd.f32 %v1103_v48, %v1101_v50 }
 0x133   : > { %v1093_v53 = vadd.f32 %v1092_v51, %v1091_v49  ;;  %v1105_v54 = vrot.slane %v1104_v52, 4 }
 0x135   : > { %v1094_v56 = vrot.slane %v1093_v53, 2  ;;  %v1106_v57 = vadd.f32 %v1105_v54, %v1104_v52 }
 0x137   : > { %v1095_v58 = vadd.f32 %v1094_v56, %v1093_v53  ;;  %v1107_v55 = vrot.slane %v1106_v57, 2 }
 0x139   : > { %v1096_v59 = vrot.slane %v1095_v58, 1  ;;  %v1108_v60 = vadd.f32 %v1107_v55, %v1106_v57 }
 0x13b   : > { %v1109_v61 = vrot.slane %v1108_v60, 1  ;;  %v1097_v62 = vadd.f32 %v1096_v59, %v1095_v58 }
 0x13d   : > { %v1110_v63 = vadd.f32 %v1109_v61, %v1108_v60 }
 0x13f   : > { %v1112_v0 = vsel %vm1111_vm4, %v1097_v62, %v1110_v63 }
 0x140   : > { %1113 = vst [vmem:[%s212_s19] sm:$0x3] %v1112_v0 }
 0x141 PF: > { %s14_s14 = sadd.s32 1, %s1667_s14   ;;  %s1971_s12 = smov %s1663_s13 }
 0x142   : > { %p11_p5 = scmp.ge.s32.totalorder %s14_s14, 4   ;;  %s1972_s13 = smov %s1974_s15 }
 0x144   :  { %13 = sbr.rel (!%p11_p5) target bundleno = 2 (0x2), region = 73 }

</bundles_post_ra>
